<compile_context>
chip_gen: v7x
topology: tpu7x:2x2x1
jax: 0.10.0
libtpu: 0.0.40
codegen_flags: <defaults>
</compile_context>

<pallas_src>
import functools

import jax
import jax.numpy as jnp
import numpy as np
from jax.experimental import pallas as pl
from jax.experimental.pallas import tpu as pltpu


# ---------------------------------------------------------------------------
# Fused kernel: conv(KHxKW) + hardswish + maxpool(PxP) + mish, B images / step
# ---------------------------------------------------------------------------
def fused_conv_pool_act_kernel(x_ref, w_ref, b_ref, o_ref, *,
                               C, OC, KH, KW, W, P, PADL):
    """
    x_ref: (B, C, H*W)       VMEM -- input with spatial flattened onto lanes
    w_ref: (C*KH*KW, OC, 1)  VMEM -- conv weights as per-sublane columns
    b_ref: (OC, 1)           VMEM -- conv bias (subtract_value already folded in)
    o_ref: (B, OC, H*W)      VMEM -- pooled+mish output in the sparse flat layout:
                                     valid values live at lane (P*a)*W + P*b
    """
    B, _, HW = x_ref.shape

    # Zero-extend the lane axis once (aligned concat at a 128-multiple) so every
    # shifted window below is a plain static slice: no wraparound, no roll.
    xf = x_ref[...]
    xf_ext = jnp.concatenate(
        [xf, jnp.zeros((B, C, PADL), xf.dtype)], axis=-1)        # (B, C, HW+PADL)

    # ---- Convolution: one lane-dense accumulator, one FMA per (i, j, c).
    # flat position q = r*W + col holds y[r, col] for r < OH, col < OW
    # (positions with col >= OW / r >= OH are garbage and never read back).
    acc = jnp.zeros((B, OC, HW), jnp.float32)
    for i in range(KH):
        for j in range(KW):
            s = i * W + j
            window = xf_ext[:, :, s:s + HW]                      # (B, C, HW) shifted view
            for c in range(C):
                wcol = w_ref[(c * KH + i) * KW + j]              # (OC, 1) per-sublane column
                acc = acc + wcol * window[:, c:c + 1, :]         # lane-bcast * sublane-bcast FMA
    v = acc + b_ref[...]                                         # + bias (lane broadcast)

    # ---- hardswish
    hsw = v * jnp.clip(v + 3.0, 0.0, 6.0) * (1.0 / 6.0)

    # ---- PxP max-pool via shifted elementwise max; the pooled value for window
    # (a, b) lands at lane (P*a)*W + P*b.  Garbage lanes never leak into it.
    hsw_ext = jnp.concatenate(
        [hsw, jnp.zeros((B, OC, PADL), hsw.dtype)], axis=-1)
    m = hsw
    for di in range(P):
        for dj in range(P):
            if di == 0 and dj == 0:
                continue
            d = di * W + dj
            m = jnp.maximum(m, hsw_ext[:, :, d:d + HW])

    # ---- mish(m) = m * t*(t+2)/(t*(t+2)+2),  t = exp(m)   (single EUP exp;
    # for m > 20 mish(m) == m to f32 precision so the clamp is exact).
    t = jnp.exp(jnp.minimum(m, 20.0))
    tt = t * (t + 2.0)
    o_ref[...] = m * tt * pl.reciprocal(tt + 2.0, approx=True)   # divide -> EUP


# ---------------------------------------------------------------------------
# Host-side wrapper
# ---------------------------------------------------------------------------
def _pick_batch_block(n):
    # Biggest batch block that still leaves a grid of >= 2 steps, so the
    # "parallel" batch axis can be split across v7x's two TensorCores.
    for cand in (8, 4, 2, 1):
        if n % cand == 0 and n // cand >= 2:
            return cand
    return 1


@functools.partial(jax.jit, static_argnums=(3, 4))
def model_forward(x, weight, bias, pool_size, sub_val):
    """x: (N, C, H, W) f32; weight: (OC, C, KH, KW); bias: (OC,)."""
    n, c, h, w = x.shape
    oc, cc, kh, kw = weight.shape
    assert cc == c
    p = int(pool_size)
    oh, ow = h - kh + 1, w - kw + 1
    poh, pow_ = oh // p, ow // p
    hw = h * w
    padl = 128
    # TODO(synk): for larger images tile the spatial axes instead of asserting.
    assert (kh - 1) * w + (kw - 1) <= padl and (p - 1) * (w + 1) <= padl

    b_blk = _pick_batch_block(n)

    x_flat = x.reshape(n, c, hw)                                 # free reshape (no extra HBM pass)
    w_cols = weight.transpose(1, 2, 3, 0).reshape(c * kh * kw, oc, 1)
    b_col = (bias - sub_val).reshape(oc, 1)                      # fold post-conv subtract into bias

    kernel = functools.partial(
        fused_conv_pool_act_kernel,
        C=c, OC=oc, KH=kh, KW=kw, W=w, P=p, PADL=padl)

    out_flat = pl.pallas_call(
        kernel,
        out_shape=jax.ShapeDtypeStruct((n, oc, hw), jnp.float32),
        grid=(n // b_blk,),
        in_specs=[
            pl.BlockSpec((b_blk, c, hw), lambda b: (b, 0, 0)),
            pl.BlockSpec((c * kh * kw, oc, 1), lambda b: (0, 0, 0)),
            pl.BlockSpec((oc, 1), lambda b: (0, 0)),
        ],
        out_specs=pl.BlockSpec((b_blk, oc, hw), lambda b: (b, 0, 0)),
        compiler_params=pltpu.CompilerParams(
            dimension_semantics=("parallel",),                   # batch split across TCs on v7x
        ),
    )(x_flat, w_cols, b_col)

    # Compact the sparse flat pooled layout -> NCHW.
    # TODO(synk): at production shapes do this compaction in-kernel.
    out = out_flat.reshape(n, oc, h, w)[:, :, 0:p * poh:p, 0:p * pow_:p]
    return out                                                   # (N, OC, OH//p, OW//p)


# ---------------------------------------------------------------------------
# Pure-JAX reference (for correctness check)
# ---------------------------------------------------------------------------
def reference_forward(x, weight, bias, pool_size, sub_val):
    y = jax.lax.conv_general_dilated(
        x, weight, window_strides=(1, 1), padding="VALID",
        dimension_numbers=("NCHW", "OIHW", "NCHW"),
        precision=jax.lax.Precision.HIGHEST,
    ) + bias.reshape(1, -1, 1, 1)
    v = y - sub_val
    hsw = v * jnp.clip(v + 3.0, 0.0, 6.0) / 6.0
    n, cc, hh, ww = hsw.shape
    p = pool_size
    poh, pow_ = hh // p, ww // p
    win = hsw[:, :, :poh * p, :pow_ * p]
    pooled = win.reshape(n, cc, poh, p, pow_, p).max(axis=(3, 5))
    return pooled * jnp.tanh(jnp.log1p(jnp.exp(pooled)))


if __name__ == "__main__":
    # Small shapes consistent with the module.
    N, C_in, C_out = 2, 4, 8
    H = W = 16
    K = 3
    subtract_value = 0.5
    pool_kernel_size = 2

    key = jax.random.PRNGKey(0)
    kx, kw_, kb = jax.random.split(key, 3)

    x = jax.random.normal(kx, (N, C_in, H, W), dtype=jnp.float32)
    fan_in = C_in * K * K
    bound = 1.0 / np.sqrt(fan_in)
    weight = jax.random.uniform(kw_, (C_out, C_in, K, K), jnp.float32, -bound, bound)
    bias = jax.random.uniform(kb, (C_out,), jnp.float32, -bound, bound)

    # Mirror the module: the conv has a bias, so subtract_value is folded into
    # it at init time and the fused stage runs with sub == 0.0.
    bias_eff = bias - subtract_value
    sub_val = 0.0

    out = model_forward(x, weight, bias_eff, pool_kernel_size, sub_val)
    out = jax.block_until_ready(out)

    ref = reference_forward(x, weight, bias_eff, pool_kernel_size, sub_val)
    # Tolerance allows for pl.reciprocal(approx=True) in the mish epilogue.
    np.testing.assert_allclose(np.asarray(out), np.asarray(ref), rtol=5e-3, atol=1e-3)

    print("KERNEL_OK")
</pallas_src>

<mosaic_0001>
module attributes {stable_mosaic.version = 11 : i64} {
  func.func @fused_conv_pool_act_kernel(%arg0: i32, %arg1: memref<1x4x256xf32, #tpu.memory_space<vmem>>, %arg2: memref<36x8x1xf32, #tpu.memory_space<vmem>>, %arg3: memref<8x1xf32, #tpu.memory_space<vmem>>, %arg4: memref<1x8x256xf32, #tpu.memory_space<vmem>>) attributes {dimension_semantics = [#tpu.dimension_semantics<parallel>], iteration_bounds = array<i64: 2>, scalar_prefetch = 0 : i64, scratch_operands = 0 : i64, tpu.core_type = #tpu.core_type<tc>, window_params = [{transform_indices = @transform_0, window_bounds = array<i64: 1, 4, 256>}, {pipeline_mode = #tpu.pipeline_mode<synchronous>, transform_indices = @transform_1, window_bounds = array<i64: 36, 8, 1>}, {pipeline_mode = #tpu.pipeline_mode<synchronous>, transform_indices = @transform_2, window_bounds = array<i64: 8, 1>}, {transform_indices = @transform_3, window_bounds = array<i64: 1, 8, 256>}]} {
    %c0 = arith.constant 0 : index
    %c0_0 = arith.constant 0 : index
    %c0_1 = arith.constant 0 : index
    %0 = vector.load %arg1[%c0, %c0_0, %c0_1] : memref<1x4x256xf32, #tpu.memory_space<vmem>>, vector<1x4x256xf32>
    %cst = arith.constant 0.000000e+00 : f32
    %1 = vector.broadcast %cst : f32 to vector<1x4x128xf32>
    %2 = tpu.concatenate %0, %1 in 2 : vector<1x4x256xf32>, vector<1x4x128xf32> -> vector<1x4x384xf32>
    %cst_2 = arith.constant 0.000000e+00 : f32
    %3 = vector.broadcast %cst_2 : f32 to vector<1x8x256xf32>
    %4 = vector.extract_strided_slice %2 {offsets = [0, 0, 0], sizes = [1, 4, 256], strides = [1, 1, 1]} : vector<1x4x384xf32> to vector<1x4x256xf32>
    %c0_3 = arith.constant 0 : index
    %c0_4 = arith.constant 0 : index
    %c0_5 = arith.constant 0 : index
    %5 = vector.load %arg2[%c0_3, %c0_4, %c0_5] : memref<36x8x1xf32, #tpu.memory_space<vmem>>, vector<1x8x1xf32>
    %6 = vector.shape_cast %5 : vector<1x8x1xf32> to vector<8x1xf32>
    %7 = vector.extract_strided_slice %4 {offsets = [0, 0, 0], sizes = [1, 1, 256], strides = [1, 1, 1]} : vector<1x4x256xf32> to vector<1x1x256xf32>
    %8 = vector.shape_cast %6 : vector<8x1xf32> to vector<1x8x1xf32>
    %9 = vector.broadcast %8 : vector<1x8x1xf32> to vector<1x8x256xf32>
    %10 = vector.broadcast %7 : vector<1x1x256xf32> to vector<1x8x256xf32>
    %11 = arith.mulf %9, %10 : vector<1x8x256xf32>
    %12 = arith.addf %3, %11 : vector<1x8x256xf32>
    %c9 = arith.constant 9 : index
    %c0_6 = arith.constant 0 : index
    %c0_7 = arith.constant 0 : index
    %13 = vector.load %arg2[%c9, %c0_6, %c0_7] : memref<36x8x1xf32, #tpu.memory_space<vmem>>, vector<1x8x1xf32>
    %14 = vector.shape_cast %13 : vector<1x8x1xf32> to vector<8x1xf32>
    %15 = vector.extract_strided_slice %4 {offsets = [0, 1, 0], sizes = [1, 1, 256], strides = [1, 1, 1]} : vector<1x4x256xf32> to vector<1x1x256xf32>
    %16 = vector.shape_cast %14 : vector<8x1xf32> to vector<1x8x1xf32>
    %17 = vector.broadcast %16 : vector<1x8x1xf32> to vector<1x8x256xf32>
    %18 = vector.broadcast %15 : vector<1x1x256xf32> to vector<1x8x256xf32>
    %19 = arith.mulf %17, %18 : vector<1x8x256xf32>
    %20 = arith.addf %12, %19 : vector<1x8x256xf32>
    %c18 = arith.constant 18 : index
    %c0_8 = arith.constant 0 : index
    %c0_9 = arith.constant 0 : index
    %21 = vector.load %arg2[%c18, %c0_8, %c0_9] : memref<36x8x1xf32, #tpu.memory_space<vmem>>, vector<1x8x1xf32>
    %22 = vector.shape_cast %21 : vector<1x8x1xf32> to vector<8x1xf32>
    %23 = vector.extract_strided_slice %4 {offsets = [0, 2, 0], sizes = [1, 1, 256], strides = [1, 1, 1]} : vector<1x4x256xf32> to vector<1x1x256xf32>
    %24 = vector.shape_cast %22 : vector<8x1xf32> to vector<1x8x1xf32>
    %25 = vector.broadcast %24 : vector<1x8x1xf32> to vector<1x8x256xf32>
    %26 = vector.broadcast %23 : vector<1x1x256xf32> to vector<1x8x256xf32>
    %27 = arith.mulf %25, %26 : vector<1x8x256xf32>
    %28 = arith.addf %20, %27 : vector<1x8x256xf32>
    %c27 = arith.constant 27 : index
    %c0_10 = arith.constant 0 : index
    %c0_11 = arith.constant 0 : index
    %29 = vector.load %arg2[%c27, %c0_10, %c0_11] : memref<36x8x1xf32, #tpu.memory_space<vmem>>, vector<1x8x1xf32>
    %30 = vector.shape_cast %29 : vector<1x8x1xf32> to vector<8x1xf32>
    %31 = vector.extract_strided_slice %4 {offsets = [0, 3, 0], sizes = [1, 1, 256], strides = [1, 1, 1]} : vector<1x4x256xf32> to vector<1x1x256xf32>
    %32 = vector.shape_cast %30 : vector<8x1xf32> to vector<1x8x1xf32>
    %33 = vector.broadcast %32 : vector<1x8x1xf32> to vector<1x8x256xf32>
    %34 = vector.broadcast %31 : vector<1x1x256xf32> to vector<1x8x256xf32>
    %35 = arith.mulf %33, %34 : vector<1x8x256xf32>
    %36 = arith.addf %28, %35 : vector<1x8x256xf32>
    %37 = vector.extract_strided_slice %2 {offsets = [0, 0, 1], sizes = [1, 4, 256], strides = [1, 1, 1]} : vector<1x4x384xf32> to vector<1x4x256xf32>
    %c1 = arith.constant 1 : index
    %c0_12 = arith.constant 0 : index
    %c0_13 = arith.constant 0 : index
    %38 = vector.load %arg2[%c1, %c0_12, %c0_13] : memref<36x8x1xf32, #tpu.memory_space<vmem>>, vector<1x8x1xf32>
    %39 = vector.shape_cast %38 : vector<1x8x1xf32> to vector<8x1xf32>
    %40 = vector.extract_strided_slice %37 {offsets = [0, 0, 0], sizes = [1, 1, 256], strides = [1, 1, 1]} : vector<1x4x256xf32> to vector<1x1x256xf32>
    %41 = vector.shape_cast %39 : vector<8x1xf32> to vector<1x8x1xf32>
    %42 = vector.broadcast %41 : vector<1x8x1xf32> to vector<1x8x256xf32>
    %43 = vector.broadcast %40 : vector<1x1x256xf32> to vector<1x8x256xf32>
    %44 = arith.mulf %42, %43 : vector<1x8x256xf32>
    %45 = arith.addf %36, %44 : vector<1x8x256xf32>
    %c10 = arith.constant 10 : index
    %c0_14 = arith.constant 0 : index
    %c0_15 = arith.constant 0 : index
    %46 = vector.load %arg2[%c10, %c0_14, %c0_15] : memref<36x8x1xf32, #tpu.memory_space<vmem>>, vector<1x8x1xf32>
    %47 = vector.shape_cast %46 : vector<1x8x1xf32> to vector<8x1xf32>
    %48 = vector.extract_strided_slice %37 {offsets = [0, 1, 0], sizes = [1, 1, 256], strides = [1, 1, 1]} : vector<1x4x256xf32> to vector<1x1x256xf32>
    %49 = vector.shape_cast %47 : vector<8x1xf32> to vector<1x8x1xf32>
    %50 = vector.broadcast %49 : vector<1x8x1xf32> to vector<1x8x256xf32>
    %51 = vector.broadcast %48 : vector<1x1x256xf32> to vector<1x8x256xf32>
    %52 = arith.mulf %50, %51 : vector<1x8x256xf32>
    %53 = arith.addf %45, %52 : vector<1x8x256xf32>
    %c19 = arith.constant 19 : index
    %c0_16 = arith.constant 0 : index
    %c0_17 = arith.constant 0 : index
    %54 = vector.load %arg2[%c19, %c0_16, %c0_17] : memref<36x8x1xf32, #tpu.memory_space<vmem>>, vector<1x8x1xf32>
    %55 = vector.shape_cast %54 : vector<1x8x1xf32> to vector<8x1xf32>
    %56 = vector.extract_strided_slice %37 {offsets = [0, 2, 0], sizes = [1, 1, 256], strides = [1, 1, 1]} : vector<1x4x256xf32> to vector<1x1x256xf32>
    %57 = vector.shape_cast %55 : vector<8x1xf32> to vector<1x8x1xf32>
    %58 = vector.broadcast %57 : vector<1x8x1xf32> to vector<1x8x256xf32>
    %59 = vector.broadcast %56 : vector<1x1x256xf32> to vector<1x8x256xf32>
    %60 = arith.mulf %58, %59 : vector<1x8x256xf32>
    %61 = arith.addf %53, %60 : vector<1x8x256xf32>
    %c28 = arith.constant 28 : index
    %c0_18 = arith.constant 0 : index
    %c0_19 = arith.constant 0 : index
    %62 = vector.load %arg2[%c28, %c0_18, %c0_19] : memref<36x8x1xf32, #tpu.memory_space<vmem>>, vector<1x8x1xf32>
    %63 = vector.shape_cast %62 : vector<1x8x1xf32> to vector<8x1xf32>
    %64 = vector.extract_strided_slice %37 {offsets = [0, 3, 0], sizes = [1, 1, 256], strides = [1, 1, 1]} : vector<1x4x256xf32> to vector<1x1x256xf32>
    %65 = vector.shape_cast %63 : vector<8x1xf32> to vector<1x8x1xf32>
    %66 = vector.broadcast %65 : vector<1x8x1xf32> to vector<1x8x256xf32>
    %67 = vector.broadcast %64 : vector<1x1x256xf32> to vector<1x8x256xf32>
    %68 = arith.mulf %66, %67 : vector<1x8x256xf32>
    %69 = arith.addf %61, %68 : vector<1x8x256xf32>
    %70 = vector.extract_strided_slice %2 {offsets = [0, 0, 2], sizes = [1, 4, 256], strides = [1, 1, 1]} : vector<1x4x384xf32> to vector<1x4x256xf32>
    %c2 = arith.constant 2 : index
    %c0_20 = arith.constant 0 : index
    %c0_21 = arith.constant 0 : index
    %71 = vector.load %arg2[%c2, %c0_20, %c0_21] : memref<36x8x1xf32, #tpu.memory_space<vmem>>, vector<1x8x1xf32>
    %72 = vector.shape_cast %71 : vector<1x8x1xf32> to vector<8x1xf32>
    %73 = vector.extract_strided_slice %70 {offsets = [0, 0, 0], sizes = [1, 1, 256], strides = [1, 1, 1]} : vector<1x4x256xf32> to vector<1x1x256xf32>
    %74 = vector.shape_cast %72 : vector<8x1xf32> to vector<1x8x1xf32>
    %75 = vector.broadcast %74 : vector<1x8x1xf32> to vector<1x8x256xf32>
    %76 = vector.broadcast %73 : vector<1x1x256xf32> to vector<1x8x256xf32>
    %77 = arith.mulf %75, %76 : vector<1x8x256xf32>
    %78 = arith.addf %69, %77 : vector<1x8x256xf32>
    %c11 = arith.constant 11 : index
    %c0_22 = arith.constant 0 : index
    %c0_23 = arith.constant 0 : index
    %79 = vector.load %arg2[%c11, %c0_22, %c0_23] : memref<36x8x1xf32, #tpu.memory_space<vmem>>, vector<1x8x1xf32>
    %80 = vector.shape_cast %79 : vector<1x8x1xf32> to vector<8x1xf32>
    %81 = vector.extract_strided_slice %70 {offsets = [0, 1, 0], sizes = [1, 1, 256], strides = [1, 1, 1]} : vector<1x4x256xf32> to vector<1x1x256xf32>
    %82 = vector.shape_cast %80 : vector<8x1xf32> to vector<1x8x1xf32>
    %83 = vector.broadcast %82 : vector<1x8x1xf32> to vector<1x8x256xf32>
    %84 = vector.broadcast %81 : vector<1x1x256xf32> to vector<1x8x256xf32>
    %85 = arith.mulf %83, %84 : vector<1x8x256xf32>
    %86 = arith.addf %78, %85 : vector<1x8x256xf32>
    %c20 = arith.constant 20 : index
    %c0_24 = arith.constant 0 : index
    %c0_25 = arith.constant 0 : index
    %87 = vector.load %arg2[%c20, %c0_24, %c0_25] : memref<36x8x1xf32, #tpu.memory_space<vmem>>, vector<1x8x1xf32>
    %88 = vector.shape_cast %87 : vector<1x8x1xf32> to vector<8x1xf32>
    %89 = vector.extract_strided_slice %70 {offsets = [0, 2, 0], sizes = [1, 1, 256], strides = [1, 1, 1]} : vector<1x4x256xf32> to vector<1x1x256xf32>
    %90 = vector.shape_cast %88 : vector<8x1xf32> to vector<1x8x1xf32>
    %91 = vector.broadcast %90 : vector<1x8x1xf32> to vector<1x8x256xf32>
    %92 = vector.broadcast %89 : vector<1x1x256xf32> to vector<1x8x256xf32>
    %93 = arith.mulf %91, %92 : vector<1x8x256xf32>
    %94 = arith.addf %86, %93 : vector<1x8x256xf32>
    %c29 = arith.constant 29 : index
    %c0_26 = arith.constant 0 : index
    %c0_27 = arith.constant 0 : index
    %95 = vector.load %arg2[%c29, %c0_26, %c0_27] : memref<36x8x1xf32, #tpu.memory_space<vmem>>, vector<1x8x1xf32>
    %96 = vector.shape_cast %95 : vector<1x8x1xf32> to vector<8x1xf32>
    %97 = vector.extract_strided_slice %70 {offsets = [0, 3, 0], sizes = [1, 1, 256], strides = [1, 1, 1]} : vector<1x4x256xf32> to vector<1x1x256xf32>
    %98 = vector.shape_cast %96 : vector<8x1xf32> to vector<1x8x1xf32>
    %99 = vector.broadcast %98 : vector<1x8x1xf32> to vector<1x8x256xf32>
    %100 = vector.broadcast %97 : vector<1x1x256xf32> to vector<1x8x256xf32>
    %101 = arith.mulf %99, %100 : vector<1x8x256xf32>
    %102 = arith.addf %94, %101 : vector<1x8x256xf32>
    %103 = vector.extract_strided_slice %2 {offsets = [0, 0, 16], sizes = [1, 4, 256], strides = [1, 1, 1]} : vector<1x4x384xf32> to vector<1x4x256xf32>
    %c3 = arith.constant 3 : index
    %c0_28 = arith.constant 0 : index
    %c0_29 = arith.constant 0 : index
    %104 = vector.load %arg2[%c3, %c0_28, %c0_29] : memref<36x8x1xf32, #tpu.memory_space<vmem>>, vector<1x8x1xf32>
    %105 = vector.shape_cast %104 : vector<1x8x1xf32> to vector<8x1xf32>
    %106 = vector.extract_strided_slice %103 {offsets = [0, 0, 0], sizes = [1, 1, 256], strides = [1, 1, 1]} : vector<1x4x256xf32> to vector<1x1x256xf32>
    %107 = vector.shape_cast %105 : vector<8x1xf32> to vector<1x8x1xf32>
    %108 = vector.broadcast %107 : vector<1x8x1xf32> to vector<1x8x256xf32>
    %109 = vector.broadcast %106 : vector<1x1x256xf32> to vector<1x8x256xf32>
    %110 = arith.mulf %108, %109 : vector<1x8x256xf32>
    %111 = arith.addf %102, %110 : vector<1x8x256xf32>
    %c12 = arith.constant 12 : index
    %c0_30 = arith.constant 0 : index
    %c0_31 = arith.constant 0 : index
    %112 = vector.load %arg2[%c12, %c0_30, %c0_31] : memref<36x8x1xf32, #tpu.memory_space<vmem>>, vector<1x8x1xf32>
    %113 = vector.shape_cast %112 : vector<1x8x1xf32> to vector<8x1xf32>
    %114 = vector.extract_strided_slice %103 {offsets = [0, 1, 0], sizes = [1, 1, 256], strides = [1, 1, 1]} : vector<1x4x256xf32> to vector<1x1x256xf32>
    %115 = vector.shape_cast %113 : vector<8x1xf32> to vector<1x8x1xf32>
    %116 = vector.broadcast %115 : vector<1x8x1xf32> to vector<1x8x256xf32>
    %117 = vector.broadcast %114 : vector<1x1x256xf32> to vector<1x8x256xf32>
    %118 = arith.mulf %116, %117 : vector<1x8x256xf32>
    %119 = arith.addf %111, %118 : vector<1x8x256xf32>
    %c21 = arith.constant 21 : index
    %c0_32 = arith.constant 0 : index
    %c0_33 = arith.constant 0 : index
    %120 = vector.load %arg2[%c21, %c0_32, %c0_33] : memref<36x8x1xf32, #tpu.memory_space<vmem>>, vector<1x8x1xf32>
    %121 = vector.shape_cast %120 : vector<1x8x1xf32> to vector<8x1xf32>
    %122 = vector.extract_strided_slice %103 {offsets = [0, 2, 0], sizes = [1, 1, 256], strides = [1, 1, 1]} : vector<1x4x256xf32> to vector<1x1x256xf32>
    %123 = vector.shape_cast %121 : vector<8x1xf32> to vector<1x8x1xf32>
    %124 = vector.broadcast %123 : vector<1x8x1xf32> to vector<1x8x256xf32>
    %125 = vector.broadcast %122 : vector<1x1x256xf32> to vector<1x8x256xf32>
    %126 = arith.mulf %124, %125 : vector<1x8x256xf32>
    %127 = arith.addf %119, %126 : vector<1x8x256xf32>
    %c30 = arith.constant 30 : index
    %c0_34 = arith.constant 0 : index
    %c0_35 = arith.constant 0 : index
    %128 = vector.load %arg2[%c30, %c0_34, %c0_35] : memref<36x8x1xf32, #tpu.memory_space<vmem>>, vector<1x8x1xf32>
    %129 = vector.shape_cast %128 : vector<1x8x1xf32> to vector<8x1xf32>
    %130 = vector.extract_strided_slice %103 {offsets = [0, 3, 0], sizes = [1, 1, 256], strides = [1, 1, 1]} : vector<1x4x256xf32> to vector<1x1x256xf32>
    %131 = vector.shape_cast %129 : vector<8x1xf32> to vector<1x8x1xf32>
    %132 = vector.broadcast %131 : vector<1x8x1xf32> to vector<1x8x256xf32>
    %133 = vector.broadcast %130 : vector<1x1x256xf32> to vector<1x8x256xf32>
    %134 = arith.mulf %132, %133 : vector<1x8x256xf32>
    %135 = arith.addf %127, %134 : vector<1x8x256xf32>
    %136 = vector.extract_strided_slice %2 {offsets = [0, 0, 17], sizes = [1, 4, 256], strides = [1, 1, 1]} : vector<1x4x384xf32> to vector<1x4x256xf32>
    %c4 = arith.constant 4 : index
    %c0_36 = arith.constant 0 : index
    %c0_37 = arith.constant 0 : index
    %137 = vector.load %arg2[%c4, %c0_36, %c0_37] : memref<36x8x1xf32, #tpu.memory_space<vmem>>, vector<1x8x1xf32>
    %138 = vector.shape_cast %137 : vector<1x8x1xf32> to vector<8x1xf32>
    %139 = vector.extract_strided_slice %136 {offsets = [0, 0, 0], sizes = [1, 1, 256], strides = [1, 1, 1]} : vector<1x4x256xf32> to vector<1x1x256xf32>
    %140 = vector.shape_cast %138 : vector<8x1xf32> to vector<1x8x1xf32>
    %141 = vector.broadcast %140 : vector<1x8x1xf32> to vector<1x8x256xf32>
    %142 = vector.broadcast %139 : vector<1x1x256xf32> to vector<1x8x256xf32>
    %143 = arith.mulf %141, %142 : vector<1x8x256xf32>
    %144 = arith.addf %135, %143 : vector<1x8x256xf32>
    %c13 = arith.constant 13 : index
    %c0_38 = arith.constant 0 : index
    %c0_39 = arith.constant 0 : index
    %145 = vector.load %arg2[%c13, %c0_38, %c0_39] : memref<36x8x1xf32, #tpu.memory_space<vmem>>, vector<1x8x1xf32>
    %146 = vector.shape_cast %145 : vector<1x8x1xf32> to vector<8x1xf32>
    %147 = vector.extract_strided_slice %136 {offsets = [0, 1, 0], sizes = [1, 1, 256], strides = [1, 1, 1]} : vector<1x4x256xf32> to vector<1x1x256xf32>
    %148 = vector.shape_cast %146 : vector<8x1xf32> to vector<1x8x1xf32>
    %149 = vector.broadcast %148 : vector<1x8x1xf32> to vector<1x8x256xf32>
    %150 = vector.broadcast %147 : vector<1x1x256xf32> to vector<1x8x256xf32>
    %151 = arith.mulf %149, %150 : vector<1x8x256xf32>
    %152 = arith.addf %144, %151 : vector<1x8x256xf32>
    %c22 = arith.constant 22 : index
    %c0_40 = arith.constant 0 : index
    %c0_41 = arith.constant 0 : index
    %153 = vector.load %arg2[%c22, %c0_40, %c0_41] : memref<36x8x1xf32, #tpu.memory_space<vmem>>, vector<1x8x1xf32>
    %154 = vector.shape_cast %153 : vector<1x8x1xf32> to vector<8x1xf32>
    %155 = vector.extract_strided_slice %136 {offsets = [0, 2, 0], sizes = [1, 1, 256], strides = [1, 1, 1]} : vector<1x4x256xf32> to vector<1x1x256xf32>
    %156 = vector.shape_cast %154 : vector<8x1xf32> to vector<1x8x1xf32>
    %157 = vector.broadcast %156 : vector<1x8x1xf32> to vector<1x8x256xf32>
    %158 = vector.broadcast %155 : vector<1x1x256xf32> to vector<1x8x256xf32>
    %159 = arith.mulf %157, %158 : vector<1x8x256xf32>
    %160 = arith.addf %152, %159 : vector<1x8x256xf32>
    %c31 = arith.constant 31 : index
    %c0_42 = arith.constant 0 : index
    %c0_43 = arith.constant 0 : index
    %161 = vector.load %arg2[%c31, %c0_42, %c0_43] : memref<36x8x1xf32, #tpu.memory_space<vmem>>, vector<1x8x1xf32>
    %162 = vector.shape_cast %161 : vector<1x8x1xf32> to vector<8x1xf32>
    %163 = vector.extract_strided_slice %136 {offsets = [0, 3, 0], sizes = [1, 1, 256], strides = [1, 1, 1]} : vector<1x4x256xf32> to vector<1x1x256xf32>
    %164 = vector.shape_cast %162 : vector<8x1xf32> to vector<1x8x1xf32>
    %165 = vector.broadcast %164 : vector<1x8x1xf32> to vector<1x8x256xf32>
    %166 = vector.broadcast %163 : vector<1x1x256xf32> to vector<1x8x256xf32>
    %167 = arith.mulf %165, %166 : vector<1x8x256xf32>
    %168 = arith.addf %160, %167 : vector<1x8x256xf32>
    %169 = vector.extract_strided_slice %2 {offsets = [0, 0, 18], sizes = [1, 4, 256], strides = [1, 1, 1]} : vector<1x4x384xf32> to vector<1x4x256xf32>
    %c5 = arith.constant 5 : index
    %c0_44 = arith.constant 0 : index
    %c0_45 = arith.constant 0 : index
    %170 = vector.load %arg2[%c5, %c0_44, %c0_45] : memref<36x8x1xf32, #tpu.memory_space<vmem>>, vector<1x8x1xf32>
    %171 = vector.shape_cast %170 : vector<1x8x1xf32> to vector<8x1xf32>
    %172 = vector.extract_strided_slice %169 {offsets = [0, 0, 0], sizes = [1, 1, 256], strides = [1, 1, 1]} : vector<1x4x256xf32> to vector<1x1x256xf32>
    %173 = vector.shape_cast %171 : vector<8x1xf32> to vector<1x8x1xf32>
    %174 = vector.broadcast %173 : vector<1x8x1xf32> to vector<1x8x256xf32>
    %175 = vector.broadcast %172 : vector<1x1x256xf32> to vector<1x8x256xf32>
    %176 = arith.mulf %174, %175 : vector<1x8x256xf32>
    %177 = arith.addf %168, %176 : vector<1x8x256xf32>
    %c14 = arith.constant 14 : index
    %c0_46 = arith.constant 0 : index
    %c0_47 = arith.constant 0 : index
    %178 = vector.load %arg2[%c14, %c0_46, %c0_47] : memref<36x8x1xf32, #tpu.memory_space<vmem>>, vector<1x8x1xf32>
    %179 = vector.shape_cast %178 : vector<1x8x1xf32> to vector<8x1xf32>
    %180 = vector.extract_strided_slice %169 {offsets = [0, 1, 0], sizes = [1, 1, 256], strides = [1, 1, 1]} : vector<1x4x256xf32> to vector<1x1x256xf32>
    %181 = vector.shape_cast %179 : vector<8x1xf32> to vector<1x8x1xf32>
    %182 = vector.broadcast %181 : vector<1x8x1xf32> to vector<1x8x256xf32>
    %183 = vector.broadcast %180 : vector<1x1x256xf32> to vector<1x8x256xf32>
    %184 = arith.mulf %182, %183 : vector<1x8x256xf32>
    %185 = arith.addf %177, %184 : vector<1x8x256xf32>
    %c23 = arith.constant 23 : index
    %c0_48 = arith.constant 0 : index
    %c0_49 = arith.constant 0 : index
    %186 = vector.load %arg2[%c23, %c0_48, %c0_49] : memref<36x8x1xf32, #tpu.memory_space<vmem>>, vector<1x8x1xf32>
    %187 = vector.shape_cast %186 : vector<1x8x1xf32> to vector<8x1xf32>
    %188 = vector.extract_strided_slice %169 {offsets = [0, 2, 0], sizes = [1, 1, 256], strides = [1, 1, 1]} : vector<1x4x256xf32> to vector<1x1x256xf32>
    %189 = vector.shape_cast %187 : vector<8x1xf32> to vector<1x8x1xf32>
    %190 = vector.broadcast %189 : vector<1x8x1xf32> to vector<1x8x256xf32>
    %191 = vector.broadcast %188 : vector<1x1x256xf32> to vector<1x8x256xf32>
    %192 = arith.mulf %190, %191 : vector<1x8x256xf32>
    %193 = arith.addf %185, %192 : vector<1x8x256xf32>
    %c32 = arith.constant 32 : index
    %c0_50 = arith.constant 0 : index
    %c0_51 = arith.constant 0 : index
    %194 = vector.load %arg2[%c32, %c0_50, %c0_51] : memref<36x8x1xf32, #tpu.memory_space<vmem>>, vector<1x8x1xf32>
    %195 = vector.shape_cast %194 : vector<1x8x1xf32> to vector<8x1xf32>
    %196 = vector.extract_strided_slice %169 {offsets = [0, 3, 0], sizes = [1, 1, 256], strides = [1, 1, 1]} : vector<1x4x256xf32> to vector<1x1x256xf32>
    %197 = vector.shape_cast %195 : vector<8x1xf32> to vector<1x8x1xf32>
    %198 = vector.broadcast %197 : vector<1x8x1xf32> to vector<1x8x256xf32>
    %199 = vector.broadcast %196 : vector<1x1x256xf32> to vector<1x8x256xf32>
    %200 = arith.mulf %198, %199 : vector<1x8x256xf32>
    %201 = arith.addf %193, %200 : vector<1x8x256xf32>
    %202 = vector.extract_strided_slice %2 {offsets = [0, 0, 32], sizes = [1, 4, 256], strides = [1, 1, 1]} : vector<1x4x384xf32> to vector<1x4x256xf32>
    %c6 = arith.constant 6 : index
    %c0_52 = arith.constant 0 : index
    %c0_53 = arith.constant 0 : index
    %203 = vector.load %arg2[%c6, %c0_52, %c0_53] : memref<36x8x1xf32, #tpu.memory_space<vmem>>, vector<1x8x1xf32>
    %204 = vector.shape_cast %203 : vector<1x8x1xf32> to vector<8x1xf32>
    %205 = vector.extract_strided_slice %202 {offsets = [0, 0, 0], sizes = [1, 1, 256], strides = [1, 1, 1]} : vector<1x4x256xf32> to vector<1x1x256xf32>
    %206 = vector.shape_cast %204 : vector<8x1xf32> to vector<1x8x1xf32>
    %207 = vector.broadcast %206 : vector<1x8x1xf32> to vector<1x8x256xf32>
    %208 = vector.broadcast %205 : vector<1x1x256xf32> to vector<1x8x256xf32>
    %209 = arith.mulf %207, %208 : vector<1x8x256xf32>
    %210 = arith.addf %201, %209 : vector<1x8x256xf32>
    %c15 = arith.constant 15 : index
    %c0_54 = arith.constant 0 : index
    %c0_55 = arith.constant 0 : index
    %211 = vector.load %arg2[%c15, %c0_54, %c0_55] : memref<36x8x1xf32, #tpu.memory_space<vmem>>, vector<1x8x1xf32>
    %212 = vector.shape_cast %211 : vector<1x8x1xf32> to vector<8x1xf32>
    %213 = vector.extract_strided_slice %202 {offsets = [0, 1, 0], sizes = [1, 1, 256], strides = [1, 1, 1]} : vector<1x4x256xf32> to vector<1x1x256xf32>
    %214 = vector.shape_cast %212 : vector<8x1xf32> to vector<1x8x1xf32>
    %215 = vector.broadcast %214 : vector<1x8x1xf32> to vector<1x8x256xf32>
    %216 = vector.broadcast %213 : vector<1x1x256xf32> to vector<1x8x256xf32>
    %217 = arith.mulf %215, %216 : vector<1x8x256xf32>
    %218 = arith.addf %210, %217 : vector<1x8x256xf32>
    %c24 = arith.constant 24 : index
    %c0_56 = arith.constant 0 : index
    %c0_57 = arith.constant 0 : index
    %219 = vector.load %arg2[%c24, %c0_56, %c0_57] : memref<36x8x1xf32, #tpu.memory_space<vmem>>, vector<1x8x1xf32>
    %220 = vector.shape_cast %219 : vector<1x8x1xf32> to vector<8x1xf32>
    %221 = vector.extract_strided_slice %202 {offsets = [0, 2, 0], sizes = [1, 1, 256], strides = [1, 1, 1]} : vector<1x4x256xf32> to vector<1x1x256xf32>
    %222 = vector.shape_cast %220 : vector<8x1xf32> to vector<1x8x1xf32>
    %223 = vector.broadcast %222 : vector<1x8x1xf32> to vector<1x8x256xf32>
    %224 = vector.broadcast %221 : vector<1x1x256xf32> to vector<1x8x256xf32>
    %225 = arith.mulf %223, %224 : vector<1x8x256xf32>
    %226 = arith.addf %218, %225 : vector<1x8x256xf32>
    %c33 = arith.constant 33 : index
    %c0_58 = arith.constant 0 : index
    %c0_59 = arith.constant 0 : index
    %227 = vector.load %arg2[%c33, %c0_58, %c0_59] : memref<36x8x1xf32, #tpu.memory_space<vmem>>, vector<1x8x1xf32>
    %228 = vector.shape_cast %227 : vector<1x8x1xf32> to vector<8x1xf32>
    %229 = vector.extract_strided_slice %202 {offsets = [0, 3, 0], sizes = [1, 1, 256], strides = [1, 1, 1]} : vector<1x4x256xf32> to vector<1x1x256xf32>
    %230 = vector.shape_cast %228 : vector<8x1xf32> to vector<1x8x1xf32>
    %231 = vector.broadcast %230 : vector<1x8x1xf32> to vector<1x8x256xf32>
    %232 = vector.broadcast %229 : vector<1x1x256xf32> to vector<1x8x256xf32>
    %233 = arith.mulf %231, %232 : vector<1x8x256xf32>
    %234 = arith.addf %226, %233 : vector<1x8x256xf32>
    %235 = vector.extract_strided_slice %2 {offsets = [0, 0, 33], sizes = [1, 4, 256], strides = [1, 1, 1]} : vector<1x4x384xf32> to vector<1x4x256xf32>
    %c7 = arith.constant 7 : index
    %c0_60 = arith.constant 0 : index
    %c0_61 = arith.constant 0 : index
    %236 = vector.load %arg2[%c7, %c0_60, %c0_61] : memref<36x8x1xf32, #tpu.memory_space<vmem>>, vector<1x8x1xf32>
    %237 = vector.shape_cast %236 : vector<1x8x1xf32> to vector<8x1xf32>
    %238 = vector.extract_strided_slice %235 {offsets = [0, 0, 0], sizes = [1, 1, 256], strides = [1, 1, 1]} : vector<1x4x256xf32> to vector<1x1x256xf32>
    %239 = vector.shape_cast %237 : vector<8x1xf32> to vector<1x8x1xf32>
    %240 = vector.broadcast %239 : vector<1x8x1xf32> to vector<1x8x256xf32>
    %241 = vector.broadcast %238 : vector<1x1x256xf32> to vector<1x8x256xf32>
    %242 = arith.mulf %240, %241 : vector<1x8x256xf32>
    %243 = arith.addf %234, %242 : vector<1x8x256xf32>
    %c16 = arith.constant 16 : index
    %c0_62 = arith.constant 0 : index
    %c0_63 = arith.constant 0 : index
    %244 = vector.load %arg2[%c16, %c0_62, %c0_63] : memref<36x8x1xf32, #tpu.memory_space<vmem>>, vector<1x8x1xf32>
    %245 = vector.shape_cast %244 : vector<1x8x1xf32> to vector<8x1xf32>
    %246 = vector.extract_strided_slice %235 {offsets = [0, 1, 0], sizes = [1, 1, 256], strides = [1, 1, 1]} : vector<1x4x256xf32> to vector<1x1x256xf32>
    %247 = vector.shape_cast %245 : vector<8x1xf32> to vector<1x8x1xf32>
    %248 = vector.broadcast %247 : vector<1x8x1xf32> to vector<1x8x256xf32>
    %249 = vector.broadcast %246 : vector<1x1x256xf32> to vector<1x8x256xf32>
    %250 = arith.mulf %248, %249 : vector<1x8x256xf32>
    %251 = arith.addf %243, %250 : vector<1x8x256xf32>
    %c25 = arith.constant 25 : index
    %c0_64 = arith.constant 0 : index
    %c0_65 = arith.constant 0 : index
    %252 = vector.load %arg2[%c25, %c0_64, %c0_65] : memref<36x8x1xf32, #tpu.memory_space<vmem>>, vector<1x8x1xf32>
    %253 = vector.shape_cast %252 : vector<1x8x1xf32> to vector<8x1xf32>
    %254 = vector.extract_strided_slice %235 {offsets = [0, 2, 0], sizes = [1, 1, 256], strides = [1, 1, 1]} : vector<1x4x256xf32> to vector<1x1x256xf32>
    %255 = vector.shape_cast %253 : vector<8x1xf32> to vector<1x8x1xf32>
    %256 = vector.broadcast %255 : vector<1x8x1xf32> to vector<1x8x256xf32>
    %257 = vector.broadcast %254 : vector<1x1x256xf32> to vector<1x8x256xf32>
    %258 = arith.mulf %256, %257 : vector<1x8x256xf32>
    %259 = arith.addf %251, %258 : vector<1x8x256xf32>
    %c34 = arith.constant 34 : index
    %c0_66 = arith.constant 0 : index
    %c0_67 = arith.constant 0 : index
    %260 = vector.load %arg2[%c34, %c0_66, %c0_67] : memref<36x8x1xf32, #tpu.memory_space<vmem>>, vector<1x8x1xf32>
    %261 = vector.shape_cast %260 : vector<1x8x1xf32> to vector<8x1xf32>
    %262 = vector.extract_strided_slice %235 {offsets = [0, 3, 0], sizes = [1, 1, 256], strides = [1, 1, 1]} : vector<1x4x256xf32> to vector<1x1x256xf32>
    %263 = vector.shape_cast %261 : vector<8x1xf32> to vector<1x8x1xf32>
    %264 = vector.broadcast %263 : vector<1x8x1xf32> to vector<1x8x256xf32>
    %265 = vector.broadcast %262 : vector<1x1x256xf32> to vector<1x8x256xf32>
    %266 = arith.mulf %264, %265 : vector<1x8x256xf32>
    %267 = arith.addf %259, %266 : vector<1x8x256xf32>
    %268 = vector.extract_strided_slice %2 {offsets = [0, 0, 34], sizes = [1, 4, 256], strides = [1, 1, 1]} : vector<1x4x384xf32> to vector<1x4x256xf32>
    %c8 = arith.constant 8 : index
    %c0_68 = arith.constant 0 : index
    %c0_69 = arith.constant 0 : index
    %269 = vector.load %arg2[%c8, %c0_68, %c0_69] : memref<36x8x1xf32, #tpu.memory_space<vmem>>, vector<1x8x1xf32>
    %270 = vector.shape_cast %269 : vector<1x8x1xf32> to vector<8x1xf32>
    %271 = vector.extract_strided_slice %268 {offsets = [0, 0, 0], sizes = [1, 1, 256], strides = [1, 1, 1]} : vector<1x4x256xf32> to vector<1x1x256xf32>
    %272 = vector.shape_cast %270 : vector<8x1xf32> to vector<1x8x1xf32>
    %273 = vector.broadcast %272 : vector<1x8x1xf32> to vector<1x8x256xf32>
    %274 = vector.broadcast %271 : vector<1x1x256xf32> to vector<1x8x256xf32>
    %275 = arith.mulf %273, %274 : vector<1x8x256xf32>
    %276 = arith.addf %267, %275 : vector<1x8x256xf32>
    %c17 = arith.constant 17 : index
    %c0_70 = arith.constant 0 : index
    %c0_71 = arith.constant 0 : index
    %277 = vector.load %arg2[%c17, %c0_70, %c0_71] : memref<36x8x1xf32, #tpu.memory_space<vmem>>, vector<1x8x1xf32>
    %278 = vector.shape_cast %277 : vector<1x8x1xf32> to vector<8x1xf32>
    %279 = vector.extract_strided_slice %268 {offsets = [0, 1, 0], sizes = [1, 1, 256], strides = [1, 1, 1]} : vector<1x4x256xf32> to vector<1x1x256xf32>
    %280 = vector.shape_cast %278 : vector<8x1xf32> to vector<1x8x1xf32>
    %281 = vector.broadcast %280 : vector<1x8x1xf32> to vector<1x8x256xf32>
    %282 = vector.broadcast %279 : vector<1x1x256xf32> to vector<1x8x256xf32>
    %283 = arith.mulf %281, %282 : vector<1x8x256xf32>
    %284 = arith.addf %276, %283 : vector<1x8x256xf32>
    %c26 = arith.constant 26 : index
    %c0_72 = arith.constant 0 : index
    %c0_73 = arith.constant 0 : index
    %285 = vector.load %arg2[%c26, %c0_72, %c0_73] : memref<36x8x1xf32, #tpu.memory_space<vmem>>, vector<1x8x1xf32>
    %286 = vector.shape_cast %285 : vector<1x8x1xf32> to vector<8x1xf32>
    %287 = vector.extract_strided_slice %268 {offsets = [0, 2, 0], sizes = [1, 1, 256], strides = [1, 1, 1]} : vector<1x4x256xf32> to vector<1x1x256xf32>
    %288 = vector.shape_cast %286 : vector<8x1xf32> to vector<1x8x1xf32>
    %289 = vector.broadcast %288 : vector<1x8x1xf32> to vector<1x8x256xf32>
    %290 = vector.broadcast %287 : vector<1x1x256xf32> to vector<1x8x256xf32>
    %291 = arith.mulf %289, %290 : vector<1x8x256xf32>
    %292 = arith.addf %284, %291 : vector<1x8x256xf32>
    %c35 = arith.constant 35 : index
    %c0_74 = arith.constant 0 : index
    %c0_75 = arith.constant 0 : index
    %293 = vector.load %arg2[%c35, %c0_74, %c0_75] : memref<36x8x1xf32, #tpu.memory_space<vmem>>, vector<1x8x1xf32>
    %294 = vector.shape_cast %293 : vector<1x8x1xf32> to vector<8x1xf32>
    %295 = vector.extract_strided_slice %268 {offsets = [0, 3, 0], sizes = [1, 1, 256], strides = [1, 1, 1]} : vector<1x4x256xf32> to vector<1x1x256xf32>
    %296 = vector.shape_cast %294 : vector<8x1xf32> to vector<1x8x1xf32>
    %297 = vector.broadcast %296 : vector<1x8x1xf32> to vector<1x8x256xf32>
    %298 = vector.broadcast %295 : vector<1x1x256xf32> to vector<1x8x256xf32>
    %299 = arith.mulf %297, %298 : vector<1x8x256xf32>
    %300 = arith.addf %292, %299 : vector<1x8x256xf32>
    %c0_76 = arith.constant 0 : index
    %c0_77 = arith.constant 0 : index
    %301 = vector.load %arg3[%c0_76, %c0_77] : memref<8x1xf32, #tpu.memory_space<vmem>>, vector<8x1xf32>
    %302 = vector.shape_cast %301 : vector<8x1xf32> to vector<1x8x1xf32>
    %303 = vector.broadcast %302 : vector<1x8x1xf32> to vector<1x8x256xf32>
    %304 = arith.addf %300, %303 : vector<1x8x256xf32>
    %cst_78 = arith.constant 3.000000e+00 : f32
    %305 = vector.broadcast %cst_78 : f32 to vector<1x8x256xf32>
    %306 = arith.addf %304, %305 : vector<1x8x256xf32>
    %cst_79 = arith.constant 0.000000e+00 : f32
    %cst_80 = arith.constant 6.000000e+00 : f32
    %307 = vector.broadcast %cst_79 : f32 to vector<1x8x256xf32>
    %308 = arith.maximumf %307, %306 : vector<1x8x256xf32>
    %309 = vector.broadcast %cst_80 : f32 to vector<1x8x256xf32>
    %310 = arith.minimumf %309, %308 : vector<1x8x256xf32>
    %311 = arith.mulf %304, %310 : vector<1x8x256xf32>
    %cst_81 = arith.constant 0.166666672 : f32
    %312 = vector.broadcast %cst_81 : f32 to vector<1x8x256xf32>
    %313 = arith.mulf %311, %312 : vector<1x8x256xf32>
    %cst_82 = arith.constant 0.000000e+00 : f32
    %314 = vector.broadcast %cst_82 : f32 to vector<1x8x128xf32>
    %315 = tpu.concatenate %313, %314 in 2 : vector<1x8x256xf32>, vector<1x8x128xf32> -> vector<1x8x384xf32>
    %316 = vector.extract_strided_slice %315 {offsets = [0, 0, 1], sizes = [1, 8, 256], strides = [1, 1, 1]} : vector<1x8x384xf32> to vector<1x8x256xf32>
    %317 = arith.maximumf %313, %316 : vector<1x8x256xf32>
    %318 = vector.extract_strided_slice %315 {offsets = [0, 0, 16], sizes = [1, 8, 256], strides = [1, 1, 1]} : vector<1x8x384xf32> to vector<1x8x256xf32>
    %319 = arith.maximumf %317, %318 : vector<1x8x256xf32>
    %320 = vector.extract_strided_slice %315 {offsets = [0, 0, 17], sizes = [1, 8, 256], strides = [1, 1, 1]} : vector<1x8x384xf32> to vector<1x8x256xf32>
    %321 = arith.maximumf %319, %320 : vector<1x8x256xf32>
    %cst_83 = arith.constant 2.000000e+01 : f32
    %322 = vector.broadcast %cst_83 : f32 to vector<1x8x256xf32>
    %323 = arith.minimumf %321, %322 : vector<1x8x256xf32>
    %324 = math.exp %323 : vector<1x8x256xf32>
    %cst_84 = arith.constant 2.000000e+00 : f32
    %325 = vector.broadcast %cst_84 : f32 to vector<1x8x256xf32>
    %326 = arith.addf %324, %325 : vector<1x8x256xf32>
    %327 = arith.mulf %324, %326 : vector<1x8x256xf32>
    %328 = arith.mulf %321, %327 : vector<1x8x256xf32>
    %cst_85 = arith.constant 2.000000e+00 : f32
    %329 = vector.broadcast %cst_85 : f32 to vector<1x8x256xf32>
    %330 = arith.addf %327, %329 : vector<1x8x256xf32>
    %331 = tpu.reciprocal %330 {approx = true} : vector<1x8x256xf32> -> vector<1x8x256xf32>
    %332 = arith.mulf %328, %331 : vector<1x8x256xf32>
    %c0_86 = arith.constant 0 : index
    %c0_87 = arith.constant 0 : index
    %c0_88 = arith.constant 0 : index
    %333 = vector.load %arg4[%c0_86, %c0_87, %c0_88] : memref<1x8x256xf32, #tpu.memory_space<vmem>>, vector<1x8x256xf32>
    tpu.vector_store %arg4[%c0_86, %c0_87, %c0_88], %332 {strides = array<i32>} : memref<1x8x256xf32, #tpu.memory_space<vmem>>, vector<1x8x256xf32>,
    return
  }
  func.func @transform_0(%arg0: i32) -> (i32, i32, i32) {
    %c0_i32 = arith.constant 0 : i32
    %c0_i32_0 = arith.constant 0 : i32
    %c0_i32_1 = arith.constant 0 : i32
    return %arg0, %c0_i32, %c0_i32_0 : i32, i32, i32
  }
  func.func @transform_1(%arg0: i32) -> (i32, i32, i32) {
    %c0_i32 = arith.constant 0 : i32
    %c0_i32_0 = arith.constant 0 : i32
    %c0_i32_1 = arith.constant 0 : i32
    %c0_i32_2 = arith.constant 0 : i32
    return %c0_i32, %c0_i32_0, %c0_i32_1 : i32, i32, i32
  }
  func.func @transform_2(%arg0: i32) -> (i32, i32) {
    %c0_i32 = arith.constant 0 : i32
    %c0_i32_0 = arith.constant 0 : i32
    %c0_i32_1 = arith.constant 0 : i32
    return %c0_i32, %c0_i32_0 : i32, i32
  }
  func.func @transform_3(%arg0: i32) -> (i32, i32, i32) {
    %c0_i32 = arith.constant 0 : i32
    %c0_i32_0 = arith.constant 0 : i32
    %c0_i32_1 = arith.constant 0 : i32
    return %arg0, %c0_i32, %c0_i32_0 : i32, i32, i32
  }
}

</mosaic_0001>

<bundles_post_ra>
// kernel: model_forward.1
= control target key start
LH: loop header
LB: loop body
LE: loop exit
PB: predicated region body
PF: predicated region fallthrough
CT: control target
= control target key end

     0   :  { %s1317_s12 = smov 0   ;;  %s1804_s0 = inlined_call_operand.vmem [shape: f32[2,4,256], index: 0, kind: input, shape index: {}]   ;;  %s1805_s1 = inlined_call_operand.vmem [shape: f32[36,8,1], index: 1, kind: input, shape index: {}]   ;;  %s1806_s2 = inlined_call_operand.vmem [shape: f32[8,1], index: 2, kind: input, shape index: {}]   ;;  %s1807_s3 = inlined_call_operand.vmem [shape: f32[2,8,256], index: 3, kind: output, shape index: {}]  }
   0x1 LB: > { %s1202_s13 = sadd.s32 4294967295, %s1285_s12   ;;  %p1206_p0 = scmp.ge.s32.totalorder %s1285_s12, 1  ;;  %s1285_s12 = sphi %s1317_s12, %s13_s12  }
   0x2   : > { %p137_p1 = scmp.lt.s32.totalorder %s1285_s12, 3 }
   0x4   : > { %p138_p2 = pnand %p1206_p0, %p137_p1 }
   0x5   : > { %v1212_v0 = vld [vmem:[%s1805_s1 + $0x90] sm:$0xff] (!%p138_p2)  ;;  %v175_v1 = vld [vmem:[%s1805_s1] sm:$0xff] (!%p138_p2)  ;;  %v1287_v2 = vmov (!%p138_p2), 0   ;;  %v1213_v3 = vld [vmem:[%s1805_s1 + $0xd8] sm:$0xff] (!%p138_p2)  ;;  %p161_p3 = scmp.lt.s32.totalorder (!%p138_p2), %s1202_s13, 1  ;;  %v181_v37 = vlaneseq (!%p138_p2)  ;;  %s1288_s15 = smov (!%p138_p2), 127  }
   0x6   : > { %141 = sbr.rel (%p138_p2) target bundleno = 640 (0x280), region = 32  ;;  %1269 = vset.pattern.permute.xlu1 (!%p138_p2), %v1287_v2  ;;  %1268 = vset.pattern.permute.xlu0 (!%p138_p2), %v1287_v2  ;;  %v1211_v4 = vld [vmem:[%s1805_s1 + $0x48] sm:$0xff] (!%p138_p2)  ;;  %v1220_v5 = vld [vmem:[%s1805_s1 + $0xa0] sm:$0xff] (!%p138_p2)  ;;  %v1222_v7 = vld [vmem:[%s1805_s1 + $0x18] sm:$0xff] (!%p138_p2)  ;;  %s1289_s16 = smov (!%p138_p2), 126   ;;  %vm272_vm0 = vcmask (!%p138_p2), 1039360  }
   0x7   : > { %216 = vperm.xlu1 (!%p138_p2), %1269, %v1212_v0   ;;  %178 = vperm.xlu0 (!%p138_p2), %1268, %v175_v1   ;;  %v1214_v6 = vld [vmem:[%s1805_s1 + $0x8] sm:$0xff] (!%p138_p2)  ;;  %v1215_v8 = vld [vmem:[%s1805_s1 + $0x50] sm:$0xff] (!%p138_p2)  ;;  %v1216_v10 = vld [vmem:[%s1805_s1 + $0x98] sm:$0xff] (!%p138_p2)  ;;  %v182_v38 = vshrl.u32 (!%p138_p2), %v181_v37, 7  ;;  %s1290_s17 = smov (!%p138_p2), 112   ;;  %s1291_s18 = smov (!%p138_p2), 111  }
   0x8   : > { %v1224_v9 = vld [vmem:[%s1805_s1 + $0xa8] sm:$0xff] (!%p138_p2)  ;;  %v1226_v11 = vld [vmem:[%s1805_s1 + $0x20] sm:$0xff] (!%p138_p2)  ;;  %v1228_v13 = vld [vmem:[%s1805_s1 + $0xb0] sm:$0xff] (!%p138_p2)  ;;  %s1292_s19 = smov (!%p138_p2), 110   ;;  %s1293_s20 = smov (!%p138_p2), 96   ;;  %vm382_vm1 = vcmask (!%p138_p2), 1031168  }
   0x9   : > { %v1217_v12 = vld [vmem:[%s1805_s1 + $0xe0] sm:$0xff] (!%p138_p2)  ;;  %v1218_v14 = vld [vmem:[%s1805_s1 + $0x10] sm:$0xff] (!%p138_p2)  ;;  %v1230_v15 = vld [vmem:[%s1805_s1 + $0x28] sm:$0xff] (!%p138_p2)  ;;  %v221_v40 = vsub.s32 (!%p138_p2), 2, %v182_v38  ;;  %v183_v42 = vsub.s32 (!%p138_p2), 0, %v182_v38  ;;  %v202_v43 = vsub.s32 (!%p138_p2), 1, %v182_v38 }
   0xa   : > { %v1219_v16 = vld [vmem:[%s1805_s1 + $0x58] sm:$0xff] (!%p138_p2)  ;;  %v1221_v18 = vld [vmem:[%s1805_s1 + $0xe8] sm:$0xff] (!%p138_p2)  ;;  %v1234_v19 = vld [vmem:[%s1805_s1 + $0x30] sm:$0xff] (!%p138_p2)  ;;  %s1294_s21 = smov (!%p138_p2), 95   ;;  %s1295_s22 = smov (!%p138_p2), 94   ;;  %vm483_vm2 = vcmask (!%p138_p2), 916480  }
   0xb   : > { %235 = vperm.xlu1 (!%p138_p2), %1269, %v1213_v3   ;;  %197 = vperm.xlu0 (!%p138_p2), %1268, %v1211_v4   ;;  %v1232_v17 = vld [vmem:[%s1805_s1 + $0xb8] sm:$0xff] (!%p138_p2)  ;;  %v1223_v20 = vld [vmem:[%s1805_s1 + $0x60] sm:$0xff] (!%p138_p2)  ;;  %v1225_v22 = vld [vmem:[%s1805_s1 + $0xf0] sm:$0xff] (!%p138_p2)  ;;  %vm584_vm3 = vcmask (!%p138_p2), 908288   ;;  %vm685_vm4 = vcmask (!%p138_p2), 900096   ;;  %vm786_vm5 = vcmask (!%p138_p2), 785408  }
   0xc   : > { %v1236_v21 = vld [vmem:[%s1805_s1 + $0xc0] sm:$0xff] (!%p138_p2)  ;;  %v1238_v23 = vld [vmem:[%s1805_s1 + $0x38] sm:$0xff] (!%p138_p2)  ;;  %v1227_v24 = vld [vmem:[%s1805_s1 + $0x68] sm:$0xff] (!%p138_p2)  ;;  %vm887_vm6 = vcmask (!%p138_p2), 777216   ;;  %vm988_vm7 = vcmask (!%p138_p2), 769024  }
   0xd   : > { %v1240_v25 = vld [vmem:[%s1805_s1 + $0xc8] sm:$0xff]  ;;  %v1229_v26 = vld [vmem:[%s1805_s1 + $0xf8] sm:$0xff]  ;;  %v1242_v27 = vld [vmem:[%s1805_s1 + $0x40] sm:$0xff]  ;;  %s1809_s13 = smov (!%p161_p3, %s1202_s13), 1 }
   0xe   : > { %v1231_v28 = vld [vmem:[%s1805_s1 + $0x70] sm:$0xff]  ;;  %v1233_v30 = vld [vmem:[%s1805_s1 + $0x100] sm:$0xff]  ;;  %v1235_v31 = vld [vmem:[%s1805_s1 + $0x78] sm:$0xff]  ;;  %s1248_s9 = sshll.u32 %s1809_s13, 3  ;;  %s1249_s25 = sshll.u32 %s1809_s13, 4 }
   0xf   : > { %418 = vperm.xlu1 %1269, %v1220_v5   ;;  %254 = vperm.xlu0 %1268, %v1214_v6   ;;  %v1244_v29 = vld [vmem:[%s1805_s1 + $0xd0] sm:$0xff]  ;;  %v1237_v32 = vld [vmem:[%s1805_s1 + $0x108] sm:$0xff]  ;;  %v1239_v33 = vld [vmem:[%s1805_s1 + $0x80] sm:$0xff]  ;;  %s165_s14 = scalar_lea.vmem %s1804_s0, %s1248_s9  ;;  %v240_v5 = vsub.s32 3, %v182_v38  ;;  %s170_s28 = scalar_lea.vmem %s1807_s3, %s1249_s25 }
  0x10   : > { %v1241_v34 = vld [vmem:[%s1805_s1 + $0x110] sm:$0xff]  ;;  %v1243_v35 = vld [vmem:[%s1805_s1 + $0x88] sm:$0xff]  ;;  %v1245_v36 = vld [vmem:[%s1805_s1 + $0x118] sm:$0xff] }
  0x11   : > { %v171_v39 = vld [vmem:[%s165_s14] sm:$0xff] }
  0x12   : > { %v173_v41 = vcombine.high %v171_v39, %v171_v39  ;;  %v1443_v44 = vrot.slane %v171_v39, %v221_v40  ;;  %v1447_v47 = vrot.slane %v171_v39, %v183_v42  ;;  %v1451_v49 = vrot.slane %v171_v39, %v202_v43 }
  0x13   : > { %468 = vperm.xlu1 %1269, %v1222_v7   ;;  %283 = vperm.xlu0 %1268, %v1215_v8  }
  0x14   : > { %v1445_v45 = vrot.slane %v173_v41, %v221_v40  ;;  %v1449_v48 = vrot.slane %v173_v41, %v183_v42  ;;  %v1453_v50 = vrot.slane %v173_v41, %v202_v43 }
  0x17   : > { %519 = vperm.xlu1 %1269, %v1224_v9   ;;  %311 = vperm.xlu0 %1268, %v1216_v10   ;;  %v1474_v9 = vrot.slane %v173_v41, %v240_v5 }
  0x1b   : > { %569 = vperm.xlu1 %1269, %v1226_v11   ;;  %339 = vperm.xlu0 %1268, %v1217_v12  }
  0x1f   : > { %620 = vperm.xlu1 %1269, %v1228_v13   ;;  %367 = vperm.xlu0 %1268, %v1218_v14  }
  0x23   : > { %670 = vperm.xlu1 %1269, %v1230_v15   ;;  %393 = vperm.xlu0 %1268, %v1219_v16  }
  0x27   : > { %721 = vperm.xlu1 %1269, %v1232_v17   ;;  %443 = vperm.xlu0 %1268, %v1221_v18  }
  0x2b   : > { %771 = vperm.xlu1 %1269, %v1234_v19   ;;  %494 = vperm.xlu0 %1268, %v1223_v20  }
  0x2f   : > { %822 = vperm.xlu1 %1269, %v1236_v21   ;;  %544 = vperm.xlu0 %1268, %v1225_v22   ;;  %v1488_v21 = vrot.slane %v171_v39, %v240_v5 }
  0x33   : > { %872 = vperm.xlu1 %1269, %v1238_v23   ;;  %595 = vperm.xlu0 %1268, %v1227_v24  }
  0x37   : > { %923 = vperm.xlu1 %1269, %v1240_v25   ;;  %645 = vperm.xlu0 %1268, %v1229_v26  }
  0x3b   : > { %973 = vperm.xlu1 %1269, %v1242_v27   ;;  %696 = vperm.xlu0 %1268, %v1231_v28  }
  0x3f   : > { %1024 = vperm.xlu1 %1269, %v1244_v29   ;;  %746 = vperm.xlu0 %1268, %v1233_v30  }
  0x43   : > { %797 = vperm.xlu0 %1268, %v1235_v31  }
  0x47   : > { %847 = vperm.xlu0 %1268, %v1237_v32  }
  0x4b   : > { %898 = vperm.xlu0 %1268, %v1239_v33  }
  0x4f   : > { %948 = vperm.xlu0 %1268, %v1241_v34  }
  0x53   : > { %999 = vperm.xlu0 %1268, %v1243_v35  }
  0x57   : > { %1049 = vperm.xlu0 %1268, %v1245_v36  }
  0x86   : > { %v179_v46 = vpop.permute.xlu0 %178  ;;  %v217_v51 = vpop.permute.xlu1 %216 }
  0x87   : > { %v227_v52 = vmul.f32 %v1443_v44, %v217_v51  ;;  %v228_v53 = vmul.f32 %v1445_v45, %v217_v51  ;;  %v189_v55 = vmul.f32 %v1447_v47, %v179_v46  ;;  %v190_v56 = vmul.f32 %v1449_v48, %v179_v46 }
  0x8a   : > { %v198_v54 = vpop.permute.xlu0 %197  ;;  %v1481_v13 = vpop.permute.xlu1 %235 }
  0x8b   : > { %v208_v57 = vmul.f32 %v1451_v49, %v198_v54  ;;  %v209_v58 = vmul.f32 %v1453_v50, %v198_v54 }
  0x8d   : > { %v210_v59 = vadd.f32 %v208_v57, %v189_v55  ;;  %v211_v60 = vadd.f32 %v209_v58, %v190_v56 }
  0x8e   : > { %v255_v61 = vpop.permute.xlu0 %254  ;;  %v419_v20 = vpop.permute.xlu1 %418 }
  0x8f   : > { %v1461_v62 = vadd.f32 %v227_v52, %v210_v59  ;;  %v1463_v63 = vadd.f32 %v228_v53, %v211_v60  ;;  %v260_v0 = vmul.f32 %v255_v61, %v1447_v47  ;;  %v261_v1 = vmul.f32 %v255_v61, %v1449_v48 }
  0x90   : > { %v262_v3 = vmul.f32 0.0, %v255_v61  ;;  %v421_v22 = vmul.f32 %v419_v20, %v1443_v44  ;;  %v423_v24 = vmul.f32 0.0, %v419_v20  ;;  %v422_v38 = vmul.f32 %v419_v20, %v1445_v45 }
  0x91   : > { %266 = vrot.lane.b32.xlu1 %v260_v0, %s1288_s15  ;;  %268 = vrot.lane.b32.xlu0 %v261_v1, %s1288_s15 }
  0x92   : > { %v284_v2 = vpop.permute.xlu0 %283  ;;  %v469_v29 = vpop.permute.xlu1 %468 }
  0x93   : > { %v290_v4 = vmul.f32 %v284_v2, %v1453_v50  ;;  %v289_v7 = vmul.f32 %v284_v2, %v1451_v49  ;;  %v291_v11 = vmul.f32 0.0, %v284_v2  ;;  %v471_v31 = vmul.f32 %v469_v29, %v1447_v47 }
  0x94   : > { %v473_v33 = vmul.f32 0.0, %v469_v29  ;;  %v472_v53 = vmul.f32 %v469_v29, %v1449_v48 }
  0x95   : > { %270 = vrot.lane.b32.xlu1 %v262_v3, %s1288_s15  ;;  %297 = vrot.lane.b32.xlu0 %v290_v4, %s1288_s15 }
  0x96   : > { %v312_v6 = vpop.permute.xlu0 %311  ;;  %v520_v37 = vpop.permute.xlu1 %519 }
  0x97   : > { %v318_v8 = vmul.f32 %v312_v6, %v1445_v45  ;;  %v317_v15 = vmul.f32 %v312_v6, %v1443_v44  ;;  %v319_v18 = vmul.f32 0.0, %v312_v6  ;;  %v522_v39 = vmul.f32 %v520_v37, %v1443_v44 }
  0x98   : > { %v524_v42 = vmul.f32 0.0, %v520_v37  ;;  %v523_v1 = vmul.f32 %v520_v37, %v1445_v45 }
  0x99   : > { %295 = vrot.lane.b32.xlu1 %v289_v7, %s1288_s15  ;;  %325 = vrot.lane.b32.xlu0 %v318_v8, %s1288_s15 }
  0x9a   : > { %v340_v10 = vpop.permute.xlu0 %339  ;;  %v570_v51 = vpop.permute.xlu1 %569 }
  0x9b   : > { %v346_v12 = vmul.f32 %v340_v10, %v1474_v9  ;;  %v345_v23 = vmul.f32 %v340_v10, %v1488_v21  ;;  %v347_v25 = vmul.f32 0.0, %v340_v10  ;;  %v572_v54 = vmul.f32 %v570_v51, %v1447_v47 }
  0x9c   : > { %v574_v58 = vmul.f32 0.0, %v570_v51 }
  0x9d   : > { %299 = vrot.lane.b32.xlu1 %v291_v11, %s1288_s15  ;;  %353 = vrot.lane.b32.xlu0 %v346_v12, %s1288_s15  ;;  %v573_v12 = vmul.f32 %v570_v51, %v1449_v48 }
  0x9e   : > { %v368_v14 = vpop.permute.xlu0 %367  ;;  %v621_v55 = vpop.permute.xlu1 %620 }
  0x9f   : > { %v371_v16 = vmul.f32 %v368_v14, %v1449_v48  ;;  %v370_v27 = vmul.f32 %v368_v14, %v1447_v47  ;;  %v372_v30 = vmul.f32 0.0, %v368_v14  ;;  %v623_v2 = vmul.f32 %v621_v55, %v1443_v44 }
  0xa0   : > { %v625_v6 = vmul.f32 0.0, %v621_v55 }
  0xa1   : > { %323 = vrot.lane.b32.xlu1 %v317_v15, %s1288_s15  ;;  %378 = vrot.lane.b32.xlu0 %v371_v16, %s1289_s16 }
  0xa2   : > { %v394_v17 = vpop.permute.xlu0 %393  ;;  %v671_v61 = vpop.permute.xlu1 %670 }
  0xa3   : > { %v397_v19 = vmul.f32 %v394_v17, %v1453_v50  ;;  %v396_v32 = vmul.f32 %v394_v17, %v1451_v49  ;;  %v398_v35 = vmul.f32 0.0, %v394_v17  ;;  %v673_v14 = vmul.f32 %v671_v61, %v1447_v47 }
  0xa5   : > { %327 = vrot.lane.b32.xlu1 %v319_v18, %s1288_s15  ;;  %404 = vrot.lane.b32.xlu0 %v397_v19, %s1289_s16  ;;  %v675_v18 = vmul.f32 0.0, %v671_v61 }
  0xa6   : > { %v444_v26 = vpop.permute.xlu0 %443  ;;  %v1537_v3 = vpop.permute.xlu1 %721 }
  0xa7   : > { %v447_v28 = vmul.f32 %v444_v26, %v1474_v9  ;;  %v446_v41 = vmul.f32 %v444_v26, %v1488_v21  ;;  %v448_v43 = vmul.f32 0.0, %v444_v26  ;;  %v726_v29 = vmul.f32 0.0, %v1537_v3 }
  0xa9   : > { %351 = vrot.lane.b32.xlu1 %v345_v23, %s1288_s15  ;;  %427 = vrot.lane.b32.xlu0 %v421_v22, %s1289_s16 }
  0xaa   : > { %v495_v34 = vpop.permute.xlu0 %494  ;;  %v1545_v10 = vpop.permute.xlu1 %771 }
  0xab   : > { %v498_v36 = vmul.f32 %v495_v34, %v1453_v50  ;;  %v497_v57 = vmul.f32 %v495_v34, %v1451_v49  ;;  %v499_v59 = vmul.f32 0.0, %v495_v34  ;;  %v674_v34 = vmul.f32 %v671_v61, %v1449_v48 }
  0xad   : > { %355 = vrot.lane.b32.xlu1 %v347_v25, %s1288_s15  ;;  %431 = vrot.lane.b32.xlu0 %v423_v24, %s1289_s16  ;;  %v624_v24 = vmul.f32 %v621_v55, %v1445_v45  ;;  %v724_v25 = vmul.f32 %v1537_v3, %v1443_v44 }
  0xae   : > { %v545_v40 = vpop.permute.xlu0 %544  ;;  %v1555_v15 = vpop.permute.xlu1 %822 }
  0xaf   : > { %v548_v46 = vmul.f32 %v545_v40, %v1474_v9  ;;  %v547_v5 = vmul.f32 %v545_v40, %v1488_v21  ;;  %v549_v7 = vmul.f32 0.0, %v545_v40  ;;  %v825_v51 = vmul.f32 %v1555_v15, %v1443_v44 }
  0xb1   : > { %376 = vrot.lane.b32.xlu1 %v370_v27, %s1289_s16  ;;  %454 = vrot.lane.b32.xlu0 %v447_v28, %s1289_s16 }
  0xb2   : > { %v596_v52 = vpop.permute.xlu0 %595  ;;  %v1564_v22 = vpop.permute.xlu1 %872 }
  0xb3   : > { %v599_v60 = vmul.f32 %v596_v52, %v1453_v50  ;;  %v598_v17 = vmul.f32 %v596_v52, %v1451_v49  ;;  %v600_v19 = vmul.f32 0.0, %v596_v52 }
  0xb5   : > { %380 = vrot.lane.b32.xlu1 %v372_v30, %s1289_s16  ;;  %477 = vrot.lane.b32.xlu0 %v471_v31, %s1290_s17 }
  0xb6   : > { %v646_v56 = vpop.permute.xlu0 %645  ;;  %v1575_v26 = vpop.permute.xlu1 %923 }
  0xb7   : > { %v649_v8 = vmul.f32 %v646_v56, %v1474_v9  ;;  %v648_v28 = vmul.f32 %v646_v56, %v1488_v21  ;;  %v650_v30 = vmul.f32 0.0, %v646_v56  ;;  %v247_v56 = vmul.f32 %v1474_v9, %v1481_v13 }
  0xb9   : > { %402 = vrot.lane.b32.xlu1 %v396_v32, %s1289_s16  ;;  %481 = vrot.lane.b32.xlu0 %v473_v33, %s1290_s17 }
  0xba   : > { %v1529_v0 = vpop.permute.xlu0 %696  ;;  %v1585_v32 = vpop.permute.xlu1 %973 }
  0xbb   : > { %v700_v20 = vmul.f32 %v1529_v0, %v1453_v50 }
  0xbd   : > { %406 = vrot.lane.b32.xlu1 %v398_v35, %s1289_s16  ;;  %505 = vrot.lane.b32.xlu0 %v498_v36, %s1290_s17  ;;  %v774_v35 = vmul.f32 %v1545_v10, %v1447_v47  ;;  %v776_v36 = vmul.f32 0.0, %v1545_v10 }
  0xbe   : > { %v1539_v4 = vpop.permute.xlu0 %746  ;;  %v1597_v37 = vpop.permute.xlu1 %1024 }
  0xbf   : > { %v750_v31 = vmul.f32 %v1539_v4, %v1474_v9 }
  0xc1   : > { %429 = vrot.lane.b32.xlu1 %v422_v38, %s1289_s16  ;;  %528 = vrot.lane.b32.xlu0 %v522_v39, %s1290_s17  ;;  %v699_v39 = vmul.f32 %v1529_v0, %v1451_v49 }
  0xc2   : > { %v1547_v11 = vpop.permute.xlu0 %797 }
  0xc3   : > { %v801_v40 = vmul.f32 %v1547_v11, %v1453_v50 }
  0xc5   : > { %452 = vrot.lane.b32.xlu1 %v446_v41, %s1289_s16  ;;  %532 = vrot.lane.b32.xlu0 %v524_v42, %s1290_s17 }
  0xc6   : > { %v1557_v16 = vpop.permute.xlu0 %847 }
  0xc9   : > { %456 = vrot.lane.b32.xlu1 %v448_v43, %s1289_s16  ;;  %555 = vrot.lane.b32.xlu0 %v548_v46, %s1290_s17  ;;  %v701_v43 = vmul.f32 0.0, %v1529_v0  ;;  %v246_v46 = vmul.f32 %v1488_v21, %v1481_v13  ;;  %v749_v0 = vmul.f32 %v1539_v4, %v1488_v21  ;;  %v249_v13 = vadd.f32 %v247_v56, %v1463_v63 }
  0xca   : > { %v1566_v23 = vpop.permute.xlu0 %898  ;;  %v875_v63 = vmul.f32 %v1564_v22, %v1447_v47 }
  0xcd   : > { %479 = vrot.lane.b32.xlu1 %v472_v53, %s1290_s17  ;;  %578 = vrot.lane.b32.xlu0 %v572_v54, %s1291_s18  ;;  %v725_v54 = vmul.f32 %v1537_v3, %v1445_v45 }
  0xce   : > { %v1577_v27 = vpop.permute.xlu0 %948 }
  0xd1   : > { %503 = vrot.lane.b32.xlu1 %v497_v57, %s1290_s17  ;;  %582 = vrot.lane.b32.xlu0 %v574_v58, %s1291_s18  ;;  %v248_v57 = vadd.f32 %v246_v46, %v1461_v62  ;;  %v827_v58 = vmul.f32 0.0, %v1555_v15  ;;  %v851_v62 = vmul.f32 %v1557_v16, %v1474_v9 }
  0xd2   : > { %v1587_v33 = vpop.permute.xlu0 %999 }
  0xd5   : > { %507 = vrot.lane.b32.xlu1 %v499_v59, %s1290_s17  ;;  %606 = vrot.lane.b32.xlu0 %v599_v60, %s1291_s18 }
  0xd6   : > { %v1599_v38 = vpop.permute.xlu0 %1049 }
  0xd9   : > { %530 = vrot.lane.b32.xlu1 %v523_v1, %s1290_s17  ;;  %629 = vrot.lane.b32.xlu0 %v623_v2, %s1291_s18 }
  0xdd   : > { %553 = vrot.lane.b32.xlu1 %v547_v5, %s1290_s17  ;;  %633 = vrot.lane.b32.xlu0 %v625_v6, %s1291_s18 }
  0xe1   : > { %557 = vrot.lane.b32.xlu1 %v549_v7, %s1290_s17  ;;  %656 = vrot.lane.b32.xlu0 %v649_v8, %s1291_s18  ;;  %v751_v8 = vmul.f32 0.0, %v1539_v4  ;;  %v877_v4 = vmul.f32 0.0, %v1564_v22 }
  0xe5   : > { %580 = vrot.lane.b32.xlu1 %v573_v12, %s1291_s18  ;;  %679 = vrot.lane.b32.xlu0 %v673_v14, %s1292_s19 }
  0xe9   : > { %604 = vrot.lane.b32.xlu1 %v598_v17, %s1291_s18  ;;  %683 = vrot.lane.b32.xlu0 %v675_v18, %s1292_s19 }
  0xed   : > { %608 = vrot.lane.b32.xlu1 %v600_v19, %s1291_s18  ;;  %707 = vrot.lane.b32.xlu0 %v700_v20, %s1292_s19  ;;  %v775_v19 = vmul.f32 %v1545_v10, %v1449_v48  ;;  %v802_v10 = vmul.f32 0.0, %v1547_v11 }
  0xf1   : > { %631 = vrot.lane.b32.xlu1 %v624_v24, %s1291_s18  ;;  %730 = vrot.lane.b32.xlu0 %v724_v25, %s1292_s19  ;;  %v800_v25 = vmul.f32 %v1547_v11, %v1451_v49 }
  0xf5   : > { %654 = vrot.lane.b32.xlu1 %v648_v28, %s1291_s18  ;;  %734 = vrot.lane.b32.xlu0 %v726_v29, %s1292_s19 }
  0xf9   : > { %658 = vrot.lane.b32.xlu1 %v650_v30, %s1291_s18  ;;  %757 = vrot.lane.b32.xlu0 %v750_v31, %s1292_s19 }
  0xfd   : > { %681 = vrot.lane.b32.xlu1 %v674_v34, %s1292_s19  ;;  %780 = vrot.lane.b32.xlu0 %v774_v35, %s1293_s20  ;;  %v902_v34 = vmul.f32 %v1566_v23, %v1453_v50 }
 0x101   : > { %705 = vrot.lane.b32.xlu1 %v699_v39, %s1292_s19  ;;  %784 = vrot.lane.b32.xlu0 %v776_v36, %s1293_s20 }
 0x103   : > { %v267_v41 = vpop.permute.xlu1 %266  ;;  %v269_v42 = vpop.permute.xlu0 %268 }
 0x104   : > { %v273_v55 = vsel %vm272_vm0, %v267_v41, %v269_v42  ;;  %v826_v41 = vmul.f32 %v1555_v15, %v1445_v45 }
 0x105   : > { %709 = vrot.lane.b32.xlu1 %v701_v43, %s1292_s19  ;;  %808 = vrot.lane.b32.xlu0 %v801_v40, %s1293_s20  ;;  %v277_v59 = vadd.f32 %v273_v55, %v248_v57  ;;  %v852_v57 = vmul.f32 0.0, %v1557_v16 }
 0x107   : > { %v271_v52 = vpop.permute.xlu1 %270  ;;  %v298_v53 = vpop.permute.xlu0 %297 }
 0x108   : > { %v274_v1 = vsel %vm272_vm0, %v269_v42, %v271_v52  ;;  %v926_v42 = vmul.f32 %v1575_v26, %v1443_v44  ;;  %v928_v52 = vmul.f32 0.0, %v1575_v26 }
 0x109   : > { %732 = vrot.lane.b32.xlu1 %v725_v54, %s1292_s19  ;;  %831 = vrot.lane.b32.xlu0 %v825_v51, %s1293_s20  ;;  %v278_v5 = vadd.f32 %v274_v1, %v249_v13  ;;  %v876_v1 = vmul.f32 %v1564_v22, %v1449_v48 }
 0x10b   : > { %v296_v60 = vpop.permute.xlu1 %295  ;;  %v326_v61 = vpop.permute.xlu0 %325 }
 0x10c   : > { %v301_v2 = vsel %vm272_vm0, %v296_v60, %v298_v53 }
 0x10d   : > { %v305_v3 = vadd.f32 %v301_v2, %v277_v59  ;;  %755 = vrot.lane.b32.xlu1 %v749_v0, %s1292_s19  ;;  %835 = vrot.lane.b32.xlu0 %v827_v58, %s1293_s20  ;;  %v952_v58 = vmul.f32 %v1577_v27, %v1474_v9  ;;  %v976_v2 = vmul.f32 %v1585_v32, %v1447_v47 }
 0x10f   : > { %v300_v6 = vpop.permute.xlu1 %299  ;;  %v354_v7 = vpop.permute.xlu0 %353 }
 0x110   : > { %v302_v12 = vsel %vm272_vm0, %v298_v53, %v300_v6  ;;  %v850_v53 = vmul.f32 %v1557_v16, %v1488_v21  ;;  %v901_v6 = vmul.f32 %v1566_v23, %v1451_v49 }
 0x111   : > { %v306_v14 = vadd.f32 %v302_v12, %v278_v5  ;;  %759 = vrot.lane.b32.xlu1 %v751_v8, %s1292_s19  ;;  %858 = vrot.lane.b32.xlu0 %v851_v62, %s1293_s20  ;;  %v978_v5 = vmul.f32 0.0, %v1585_v32  ;;  %v903_v12 = vmul.f32 0.0, %v1566_v23  ;;  %v927_v23 = vmul.f32 %v1575_v26, %v1445_v45 }
 0x112   : > { %v953_v26 = vmul.f32 0.0, %v1577_v27 }
 0x113   : > { %v324_v17 = vpop.permute.xlu1 %323  ;;  %v379_v18 = vpop.permute.xlu0 %378 }
 0x114   : > { %v329_v20 = vsel %vm272_vm0, %v324_v17, %v326_v61 }
 0x115   : > { %v333_v24 = vadd.f32 %v329_v20, %v305_v3  ;;  %782 = vrot.lane.b32.xlu1 %v775_v19, %s1293_s20  ;;  %881 = vrot.lane.b32.xlu0 %v875_v63, %s1294_s21 }
 0x117   : > { %v328_v28 = vpop.permute.xlu1 %327  ;;  %v405_v29 = vpop.permute.xlu0 %404 }
 0x118   : > { %v330_v30 = vsel %vm272_vm0, %v326_v61, %v328_v28 }
 0x119   : > { %v334_v31 = vadd.f32 %v330_v30, %v306_v14  ;;  %806 = vrot.lane.b32.xlu1 %v800_v25, %s1293_s20  ;;  %885 = vrot.lane.b32.xlu0 %v877_v4, %s1294_s21  ;;  %v1003_v14 = vmul.f32 %v1587_v33, %v1453_v50  ;;  %v1070_v4 = vld [vmem:[%s1806_s2] sm:$0xff]  ;;  %v1028_v30 = vmul.f32 %v1597_v37, %v1445_v45 }
 0x11b   : > { %v352_v35 = vpop.permute.xlu1 %351  ;;  %v428_v36 = vpop.permute.xlu0 %427 }
 0x11c   : > { %v357_v39 = vsel %vm272_vm0, %v352_v35, %v354_v7 }
 0x11d   : > { %v361_v40 = vadd.f32 %v357_v39, %v333_v24  ;;  %810 = vrot.lane.b32.xlu1 %v802_v10, %s1293_s20  ;;  %909 = vrot.lane.b32.xlu0 %v902_v34, %s1294_s21  ;;  %v1052_v39 = vmul.f32 %v1599_v38, %v1488_v21 }
 0x11f   : > { %v356_v43 = vpop.permute.xlu1 %355  ;;  %v432_v11 = vpop.permute.xlu0 %431 }
 0x120   : > { %v358_v46 = vsel %vm272_vm0, %v354_v7, %v356_v43 }
 0x121   : > { %v362_v51 = vadd.f32 %v358_v46, %v334_v31  ;;  %833 = vrot.lane.b32.xlu1 %v826_v41, %s1293_s20  ;;  %932 = vrot.lane.b32.xlu0 %v926_v42, %s1294_s21  ;;  %v951_v31 = vmul.f32 %v1577_v27, %v1488_v21  ;;  %v977_v46 = vmul.f32 %v1585_v32, %v1449_v48  ;;  %v1054_v27 = vmul.f32 0.0, %v1599_v38 }
 0x122   : > { %v1004_v48 = vmul.f32 0.0, %v1587_v33 }
 0x123   : > { %v377_v54 = vpop.permute.xlu1 %376  ;;  %v455_v15 = vpop.permute.xlu0 %454 }
 0x124   : > { %v383_v55 = vsel %vm382_vm1, %v377_v54, %v379_v18  ;;  %v1002_v54 = vmul.f32 %v1587_v33, %v1451_v49  ;;  %v1027_v49 = vmul.f32 %v1597_v37, %v1443_v44  ;;  %v1029_v33 = vmul.f32 0.0, %v1597_v37 }
 0x125   : > { %v387_v56 = vadd.f32 %v383_v55, %v361_v40  ;;  %856 = vrot.lane.b32.xlu1 %v850_v53, %s1293_s20  ;;  %936 = vrot.lane.b32.xlu0 %v928_v52, %s1294_s21  ;;  %v1053_v44 = vmul.f32 %v1599_v38, %v1474_v9 }
 0x127   : > { %v381_v59 = vpop.permute.xlu1 %380  ;;  %v478_v60 = vpop.permute.xlu0 %477 }
 0x128   : > { %v384_v61 = vsel %vm382_vm1, %v379_v18, %v381_v59 }
 0x129   : > { %v388_v0 = vadd.f32 %v384_v61, %v362_v51  ;;  %860 = vrot.lane.b32.xlu1 %v852_v57, %s1293_s20  ;;  %959 = vrot.lane.b32.xlu0 %v952_v58, %s1294_s21 }
 0x12b   : > { %v403_v13 = vpop.permute.xlu1 %402  ;;  %v482_v16 = vpop.permute.xlu0 %481 }
 0x12c   : > { %v408_v3 = vsel %vm382_vm1, %v403_v13, %v405_v29 }
 0x12d   : > { %v412_v62 = vadd.f32 %v408_v3, %v387_v56  ;;  %883 = vrot.lane.b32.xlu1 %v876_v1, %s1294_s21  ;;  %982 = vrot.lane.b32.xlu0 %v976_v2, %s1295_s22 }
 0x12f   : > { %v407_v7 = vpop.permute.xlu1 %406  ;;  %v506_v22 = vpop.permute.xlu0 %505 }
 0x130   : > { %v409_v8 = vsel %vm382_vm1, %v405_v29, %v407_v7 }
 0x131   : > { %v413_v47 = vadd.f32 %v409_v8, %v388_v0  ;;  %907 = vrot.lane.b32.xlu1 %v901_v6, %s1294_s21  ;;  %986 = vrot.lane.b32.xlu0 %v978_v5, %s1295_s22 }
 0x133   : > { %v430_v63 = vpop.permute.xlu1 %429  ;;  %v529_v17 = vpop.permute.xlu0 %528 }
 0x134   : > { %v433_v18 = vsel %vm382_vm1, %v428_v36, %v430_v63  ;;  %v434_v19 = vsel %vm382_vm1, %v430_v63, %v432_v11 }
 0x135   : > { %v437_v20 = vadd.f32 %v433_v18, %v412_v62  ;;  %v438_v24 = vadd.f32 %v434_v19, %v413_v47  ;;  %911 = vrot.lane.b32.xlu1 %v903_v12, %s1294_s21  ;;  %1010 = vrot.lane.b32.xlu0 %v1003_v14, %s1295_s22  ;;  %v1296_v12 = vmov 0.0  }
 0x137   : > { %v453_v50 = vpop.permute.xlu1 %452  ;;  %v533_v25 = vpop.permute.xlu0 %532 }
 0x138   : > { %v458_v28 = vsel %vm382_vm1, %v453_v50, %v455_v15 }
 0x139   : > { %v462_v29 = vadd.f32 %v458_v28, %v437_v20  ;;  %934 = vrot.lane.b32.xlu1 %v927_v23, %s1294_s21  ;;  %1073 = vperm.xlu0 %1268, %v1070_v4  }
 0x13b   : > { %v457_v10 = vpop.permute.xlu1 %456  ;;  %v556_v34 = vpop.permute.xlu0 %555 }
 0x13c   : > { %v459_v35 = vsel %vm382_vm1, %v455_v15, %v457_v10 }
 0x13d   : > { %v463_v36 = vadd.f32 %v459_v35, %v438_v24  ;;  %957 = vrot.lane.b32.xlu1 %v951_v31, %s1294_s21  ;;  %1035 = vrot.lane.b32.xlu0 %v1028_v30, %s1295_s22 }
 0x13f   : > { %v480_v40 = vpop.permute.xlu1 %479  ;;  %v579_v45 = vpop.permute.xlu0 %578 }
 0x140   : > { %v484_v41 = vsel %vm483_vm2, %v478_v60, %v480_v40  ;;  %v485_v42 = vsel %vm483_vm2, %v480_v40, %v482_v16 }
 0x141   : > { %v488_v43 = vadd.f32 %v484_v41, %v462_v29  ;;  %v489_v11 = vadd.f32 %v485_v42, %v463_v36  ;;  %961 = vrot.lane.b32.xlu1 %v953_v26, %s1294_s21  ;;  %1058 = vrot.lane.b32.xlu0 %v1052_v39, %s1295_s22 }
 0x143   : > { %v504_v51 = vpop.permute.xlu1 %503  ;;  %v583_v52 = vpop.permute.xlu0 %582 }
 0x144   : > { %v509_v21 = vsel %vm483_vm2, %v504_v51, %v506_v22 }
 0x145   : > { %v513_v53 = vadd.f32 %v509_v21, %v488_v43  ;;  %984 = vrot.lane.b32.xlu1 %v977_v46, %s1295_s22  ;;  %1062 = vrot.lane.b32.xlu0 %v1054_v27, %s1295_s22 }
 0x147   : > { %v508_v15 = vpop.permute.xlu1 %507  ;;  %v607_v55 = vpop.permute.xlu0 %606 }
 0x148   : > { %v510_v56 = vsel %vm483_vm2, %v506_v22, %v508_v15 }
 0x149   : > { %v514_v57 = vadd.f32 %v510_v56, %v489_v11  ;;  %1008 = vrot.lane.b32.xlu1 %v1002_v54, %s1295_s22  ;;  %1107 = vrot.lane.b32.xlu0 %v1296_v12, %s1290_s17 }
 0x14b   : > { %v531_v32 = vpop.permute.xlu1 %530  ;;  %v630_v58 = vpop.permute.xlu0 %629 }
 0x14c   : > { %v534_v59 = vsel %vm483_vm2, %v529_v17, %v531_v32  ;;  %v535_v60 = vsel %vm483_vm2, %v531_v32, %v533_v25 }
 0x14d   : > { %v538_v61 = vadd.f32 %v534_v59, %v513_v53  ;;  %v539_v0 = vadd.f32 %v535_v60, %v514_v57  ;;  %1012 = vrot.lane.b32.xlu1 %v1004_v48, %s1295_s22 }
 0x14f   : > { %v554_v1 = vpop.permute.xlu1 %553  ;;  %v634_v2 = vpop.permute.xlu0 %633 }
 0x150   : > { %v559_v13 = vsel %vm483_vm2, %v554_v1, %v556_v34 }
 0x151   : > { %v563_v16 = vadd.f32 %v559_v13, %v538_v61  ;;  %1033 = vrot.lane.b32.xlu1 %v1027_v49, %s1295_s22 }
 0x153   : > { %v558_v3 = vpop.permute.xlu1 %557  ;;  %v657_v62 = vpop.permute.xlu0 %656 }
 0x154   : > { %v560_v5 = vsel %vm483_vm2, %v556_v34, %v558_v3 }
 0x155   : > { %v564_v6 = vadd.f32 %v560_v5, %v539_v0  ;;  %1037 = vrot.lane.b32.xlu1 %v1029_v33, %s1295_s22 }
 0x157   : > { %v581_v7 = vpop.permute.xlu1 %580  ;;  %v680_v22 = vpop.permute.xlu0 %679 }
 0x158   : > { %v585_v8 = vsel %vm584_vm3, %v579_v45, %v581_v7  ;;  %v586_v47 = vsel %vm584_vm3, %v581_v7, %v583_v52 }
 0x159   : > { %v589_v37 = vadd.f32 %v585_v8, %v563_v16  ;;  %v590_v14 = vadd.f32 %v586_v47, %v564_v6  ;;  %1060 = vrot.lane.b32.xlu1 %v1053_v44, %s1295_s22 }
 0x15b   : > { %v605_v63 = vpop.permute.xlu1 %604  ;;  %v684_v17 = vpop.permute.xlu0 %683 }
 0x15c   : > { %v610_v18 = vsel %vm584_vm3, %v605_v63, %v607_v55 }
 0x15d   : > { %v614_v19 = vadd.f32 %v610_v18, %v589_v37  ;;  %1095 = vrot.lane.b32.xlu1 %v1296_v12, %s1288_s15 }
 0x15f   : > { %v609_v9 = vpop.permute.xlu1 %608  ;;  %v708_v38 = vpop.permute.xlu0 %707 }
 0x160   : > { %v611_v20 = vsel %vm584_vm3, %v607_v55, %v609_v9 }
 0x161   : > { %v615_v24 = vadd.f32 %v611_v20, %v590_v14 }
 0x163   : > { %v632_v4 = vpop.permute.xlu1 %631  ;;  %v731_v23 = vpop.permute.xlu0 %730 }
 0x164   : > { %v635_v50 = vsel %vm584_vm3, %v630_v58, %v632_v4  ;;  %v636_v25 = vsel %vm584_vm3, %v632_v4, %v634_v2 }
 0x165   : > { %v639_v28 = vadd.f32 %v635_v50, %v614_v19  ;;  %v640_v29 = vadd.f32 %v636_v25, %v615_v24 }
 0x167   : > { %v655_v30 = vpop.permute.xlu1 %654  ;;  %v735_v31 = vpop.permute.xlu0 %734 }
 0x168   : > { %v660_v10 = vsel %vm584_vm3, %v655_v30, %v657_v62 }
 0x169   : > { %v664_v34 = vadd.f32 %v660_v10, %v639_v28 }
 0x16b   : > { %v659_v35 = vpop.permute.xlu1 %658  ;;  %v758_v36 = vpop.permute.xlu0 %757 }
 0x16c   : > { %v661_v26 = vsel %vm584_vm3, %v657_v62, %v659_v35 }
 0x16d   : > { %v665_v39 = vadd.f32 %v661_v26, %v640_v29 }
 0x16f   : > { %v682_v40 = vpop.permute.xlu1 %681  ;;  %v781_v45 = vpop.permute.xlu0 %780 }
 0x170   : > { %v686_v41 = vsel %vm685_vm4, %v680_v22, %v682_v40  ;;  %v687_v62 = vsel %vm685_vm4, %v682_v40, %v684_v17 }
 0x171   : > { %v690_v42 = vadd.f32 %v686_v41, %v664_v34  ;;  %v691_v44 = vadd.f32 %v687_v62, %v665_v39 }
 0x173   : > { %v706_v43 = vpop.permute.xlu1 %705  ;;  %v785_v11 = vpop.permute.xlu0 %784 }
 0x174   : > { %v711_v5 = vsel %vm685_vm4, %v706_v43, %v708_v38 }
 0x175   : > { %v715_v37 = vadd.f32 %v711_v5, %v690_v42 }
 0x177   : > { %v710_v46 = vpop.permute.xlu1 %709  ;;  %v809_v27 = vpop.permute.xlu0 %808 }
 0x178   : > { %v712_v6 = vsel %vm685_vm4, %v708_v38, %v710_v46 }
 0x179   : > { %v716_v14 = vadd.f32 %v712_v6, %v691_v44 }
 0x17b   : > { %v733_v51 = vpop.permute.xlu1 %732  ;;  %v832_v52 = vpop.permute.xlu0 %831 }
 0x17c   : > { %v736_v8 = vsel %vm685_vm4, %v731_v23, %v733_v51  ;;  %v737_v47 = vsel %vm685_vm4, %v733_v51, %v735_v31 }
 0x17d   : > { %v740_v19 = vadd.f32 %v736_v8, %v715_v37  ;;  %v741_v17 = vadd.f32 %v737_v47, %v716_v14 }
 0x17f   : > { %v756_v21 = vpop.permute.xlu1 %755  ;;  %v836_v53 = vpop.permute.xlu0 %835 }
 0x180   : > { %v761_v63 = vsel %vm685_vm4, %v756_v21, %v758_v36 }
 0x181   : > { %v765_v24 = vadd.f32 %v761_v63, %v740_v19 }
 0x183   : > { %v760_v54 = vpop.permute.xlu1 %759  ;;  %v859_v15 = vpop.permute.xlu0 %858 }
 0x184   : > { %v762_v18 = vsel %vm685_vm4, %v758_v36, %v760_v54 }
 0x185   : > { %v766_v4 = vadd.f32 %v762_v18, %v741_v17 }
 0x187   : > { %v783_v55 = vpop.permute.xlu1 %782  ;;  %v882_v56 = vpop.permute.xlu0 %881 }
 0x188   : > { %v787_v20 = vsel %vm786_vm5, %v781_v45, %v783_v55  ;;  %v788_v38 = vsel %vm786_vm5, %v783_v55, %v785_v11 }
 0x189   : > { %v791_v28 = vadd.f32 %v787_v20, %v765_v24  ;;  %v792_v29 = vadd.f32 %v788_v38, %v766_v4 }
 0x18b   : > { %v807_v57 = vpop.permute.xlu1 %806  ;;  %v886_v48 = vpop.permute.xlu0 %885 }
 0x18c   : > { %v812_v23 = vsel %vm786_vm5, %v807_v57, %v809_v27 }
 0x18d   : > { %v816_v34 = vadd.f32 %v812_v23, %v791_v28 }
 0x18f   : > { %v811_v32 = vpop.permute.xlu1 %810  ;;  %v910_v58 = vpop.permute.xlu0 %909 }
 0x190   : > { %v813_v25 = vsel %vm786_vm5, %v809_v27, %v811_v32 }
 0x191   : > { %v817_v35 = vadd.f32 %v813_v25, %v792_v29 }
 0x193   : > { %v834_v59 = vpop.permute.xlu1 %833  ;;  %v933_v60 = vpop.permute.xlu0 %932 }
 0x194   : > { %v837_v31 = vsel %vm786_vm5, %v832_v52, %v834_v59  ;;  %v838_v10 = vsel %vm786_vm5, %v834_v59, %v836_v53 }
 0x195   : > { %v841_v40 = vadd.f32 %v837_v31, %v816_v34  ;;  %v842_v45 = vadd.f32 %v838_v10, %v817_v35 }
 0x197   : > { %v857_v61 = vpop.permute.xlu1 %856  ;;  %v937_v49 = vpop.permute.xlu0 %936 }
 0x198   : > { %v862_v26 = vsel %vm786_vm5, %v857_v61, %v859_v15 }
 0x199   : > { %v866_v11 = vadd.f32 %v862_v26, %v841_v40 }
 0x19b   : > { %v861_v0 = vpop.permute.xlu1 %860  ;;  %v960_v2 = vpop.permute.xlu0 %959 }
 0x19c   : > { %v863_v39 = vsel %vm786_vm5, %v859_v15, %v861_v0 }
 0x19d   : > { %v867_v46 = vadd.f32 %v863_v39, %v842_v45 }
 0x19f   : > { %v884_v1 = vpop.permute.xlu1 %883  ;;  %v983_v33 = vpop.permute.xlu0 %982 }
 0x1a0   : > { %v888_v42 = vsel %vm887_vm6, %v882_v56, %v884_v1  ;;  %v889_v43 = vsel %vm887_vm6, %v884_v1, %v886_v48 }
 0x1a1   : > { %v892_v52 = vadd.f32 %v888_v42, %v866_v11  ;;  %v893_v21 = vadd.f32 %v889_v43, %v867_v46 }
 0x1a3   : > { %v908_v13 = vpop.permute.xlu1 %907  ;;  %v987_v7 = vpop.permute.xlu0 %986 }
 0x1a4   : > { %v913_v27 = vsel %vm887_vm6, %v908_v13, %v910_v58 }
 0x1a5   : > { %v917_v57 = vadd.f32 %v913_v27, %v892_v52 }
 0x1a7   : > { %v912_v16 = vpop.permute.xlu1 %911  ;;  %v1011_v50 = vpop.permute.xlu0 %1010 }
 0x1a8   : > { %v914_v51 = vsel %vm887_vm6, %v910_v58, %v912_v16 }
 0x1a9   : > { %v918_v32 = vadd.f32 %v914_v51, %v893_v21 }
 0x1ab   : > { %v935_v3 = vpop.permute.xlu1 %934 }
 0x1ac   : > { %v938_v55 = vsel %vm887_vm6, %v933_v60, %v935_v3  ;;  %v939_v15 = vsel %vm887_vm6, %v935_v3, %v937_v49 }
 0x1ad   : > { %v942_v59 = vadd.f32 %v938_v55, %v917_v57  ;;  %v943_v61 = vadd.f32 %v939_v15, %v918_v32 }
 0x1af   : > { %v958_v22 = vpop.permute.xlu1 %957 }
 0x1b0   : > { %v963_v56 = vsel %vm887_vm6, %v958_v22, %v960_v2 }
 0x1b1   : > { %v967_v13 = vadd.f32 %v963_v56, %v942_v59 }
 0x1b3   : > { %v962_v9 = vpop.permute.xlu1 %961 }
 0x1b4   : > { %v964_v48 = vsel %vm887_vm6, %v960_v2, %v962_v9 }
 0x1b5   : > { %v968_v16 = vadd.f32 %v964_v48, %v943_v61 }
 0x1b7   : > { %v985_v30 = vpop.permute.xlu1 %984 }
 0x1b8   : > { %v1074_v36 = vpop.permute.xlu0 %1073  ;;  %v989_v58 = vsel %vm988_vm7, %v983_v33, %v985_v30  ;;  %v990_v1 = vsel %vm988_vm7, %v985_v30, %v987_v7 }
 0x1b9   : > { %v993_v3 = vadd.f32 %v989_v58, %v967_v13  ;;  %v994_v5 = vadd.f32 %v990_v1, %v968_v16 }
 0x1bb   : > { %v1009_v41 = vpop.permute.xlu1 %1008 }
 0x1bc   : > { %v1036_v53 = vpop.permute.xlu0 %1035  ;;  %v1014_v60 = vsel %vm988_vm7, %v1009_v41, %v1011_v50 }
 0x1bd   : > { %v1018_v22 = vadd.f32 %v1014_v60, %v993_v3 }
 0x1bf   : > { %v1013_v54 = vpop.permute.xlu1 %1012 }
 0x1c0   : > { %v1059_v62 = vpop.permute.xlu0 %1058  ;;  %v1015_v49 = vsel %vm988_vm7, %v1011_v50, %v1013_v54 }
 0x1c1   : > { %v1019_v8 = vadd.f32 %v1015_v49, %v994_v5 }
 0x1c3   : > { %v1034_v0 = vpop.permute.xlu1 %1033 }
 0x1c4   : > { %v1039_v44 = vsel %vm988_vm7, %v1034_v0, %v1036_v53  ;;  %v1063_v33 = vpop.permute.xlu0 %1062 }
 0x1c5   : > { %v1043_v47 = vadd.f32 %v1039_v44, %v1018_v22 }
 0x1c7   : > { %v1038_v6 = vpop.permute.xlu1 %1037 }
 0x1c8   : > { %v1040_v2 = vsel %vm988_vm7, %v1036_v53, %v1038_v6  ;;  %v1108_v10 = vpop.permute.xlu0 %1107 }
 0x1c9   : > { %v1044_v37 = vadd.f32 %v1040_v2, %v1019_v8 }
 0x1cb   : > { %v1061_v7 = vpop.permute.xlu1 %1060 }
 0x1cc   : > { %v1064_v14 = vsel %vm988_vm7, %v1059_v62, %v1061_v7  ;;  %v1065_v63 = vsel %vm988_vm7, %v1061_v7, %v1063_v33 }
 0x1cd   : > { %v1068_v18 = vadd.f32 %v1064_v14, %v1043_v47  ;;  %v1069_v19 = vadd.f32 %v1065_v63, %v1044_v37 }
 0x1cf   : > { %v1076_v17 = vadd.f32 %v1074_v36, %v1068_v18  ;;  %v1077_v9 = vadd.f32 %v1074_v36, %v1069_v19  ;;  %v1096_v31 = vpop.permute.xlu1 %1095 }
 0x1d1   : > { %v1078_v20 = vadd.f32 3.0, %v1076_v17  ;;  %v1079_v38 = vadd.f32 3.0, %v1077_v9 }
 0x1d3   : > { %v1080_v24 = vmax.f32 %v1078_v20, 0.0  ;;  %v1081_v4 = vmax.f32 %v1079_v38, 0.0 }
 0x1d5   : > { %v1082_v50 = vmin.f32 %v1080_v24, 6.0  ;;  %v1083_v23 = vmin.f32 %v1081_v4, 6.0 }
 0x1d7   : > { %v1084_v25 = vmul.f32 %v1082_v50, %v1076_v17  ;;  %v1085_v28 = vmul.f32 %v1083_v23, %v1077_v9 }
 0x1d9   : > { %v1086_v29 = vmul.f32 0.16666667, %v1084_v25  ;;  %v1087_v30 = vmul.f32 0.16666667, %v1085_v28 }
 0x1db   : > { %1091 = vrot.lane.b32.xlu1 %v1086_v29, %s1288_s15  ;;  %1093 = vrot.lane.b32.xlu0 %v1087_v30, %s1288_s15 }
 0x1df   : > { %1105 = vrot.lane.b32.xlu1 %v1087_v30, %s1290_s17  ;;  %1103 = vrot.lane.b32.xlu0 %v1086_v29, %s1290_s17 }
 0x1e3   : > { %1115 = vrot.lane.b32.xlu1 %v1086_v29, %s1291_s18  ;;  %1117 = vrot.lane.b32.xlu0 %v1087_v30, %s1291_s18 }
 0x1e7   : > { %1119 = vrot.lane.b32.xlu1 %v1296_v12, %s1291_s18 }
 0x24d   : > { %v1092_v34 = vpop.permute.xlu1 %1091  ;;  %v1094_v35 = vpop.permute.xlu0 %1093 }
 0x24e   : > { %v1097_v36 = vsel %vm272_vm0, %v1092_v34, %v1094_v35  ;;  %v1098_v41 = vsel %vm272_vm0, %v1094_v35, %v1096_v31 }
 0x24f   : > { %v1101_v45 = vmax.f32 %v1086_v29, %v1097_v36  ;;  %v1102_v27 = vmax.f32 %v1087_v30, %v1098_v41 }
 0x251   : > { %v1106_v26 = vpop.permute.xlu1 %1105  ;;  %v1104_v39 = vpop.permute.xlu0 %1103 }
 0x252   : > { %v1109_v40 = vsel %vm483_vm2, %v1104_v39, %v1106_v26  ;;  %v1110_v46 = vsel %vm483_vm2, %v1106_v26, %v1108_v10 }
 0x253   : > { %v1113_v42 = vmax.f32 %v1101_v45, %v1109_v40  ;;  %v1114_v52 = vmax.f32 %v1102_v27, %v1110_v46 }
 0x255   : > { %v1116_v43 = vpop.permute.xlu1 %1115  ;;  %v1118_v11 = vpop.permute.xlu0 %1117 }
 0x256   : > { %v1121_v12 = vsel %vm584_vm3, %v1116_v43, %v1118_v11 }
 0x257   : > { %v1125_v51 = vmax.f32 %v1113_v42, %v1121_v12 }
 0x259   : > { %v1127_v21 = vmin.f32 %v1125_v51, 20.0  ;;  %v1120_v53 = vpop.permute.xlu1 %1119 }
 0x25a   : > { %v1122_v54 = vsel %vm584_vm3, %v1118_v11, %v1120_v53 }
 0x25b   : > { %v1129_v55 = vmul.f32 1.442695, %v1127_v21  ;;  %v1126_v15 = vmax.f32 %v1114_v52, %v1122_v54 }
 0x25d   : > { %1271 = vpow2.f32 %v1129_v55  ;;  %v1128_v57 = vmin.f32 %v1126_v15, 20.0 }
 0x25f   : > { %v1131_v32 = vmul.f32 1.442695, %v1128_v57 }
 0x261   : > { %1273 = vpow2.f32 %v1131_v32 }
 0x267   : > { %v1272_v56 = vpop.eup %1271 }
 0x268   : > { %v1133_v48 = vadd.f32 2.0, %v1272_v56 }
 0x26a   : > { %v1135_v59 = vmul.f32 %v1272_v56, %v1133_v48 }
 0x26b   : > { %v1274_v61 = vpop.eup %1273 }
 0x26c   : > { %v1139_v0 = vadd.f32 2.0, %v1135_v59  ;;  %v1134_v58 = vadd.f32 2.0, %v1274_v61  ;;  %v1137_v16 = vmul.f32 %v1135_v59, %v1125_v51 }
 0x26e   : > { %1275 = vrcp.f32 %v1139_v0  ;;  %v1136_v1 = vmul.f32 %v1274_v61, %v1134_v58 }
 0x270   : > { %v1140_v13 = vadd.f32 2.0, %v1136_v1  ;;  %v1138_v49 = vmul.f32 %v1136_v1, %v1126_v15 }
 0x272   : > { %1277 = vrcp.f32 %v1140_v13 }
 0x278   : > { %v1276_v62 = vpop.eup %1275 }
 0x279   : > { %v1143_v60 = vmul.f32 %v1276_v62, %v1137_v16 }
 0x27b   : > { %1145 = vst [vmem:[%s170_s28] sm:$0xff] %v1143_v60 }
 0x27c   : > { %v1278_v3 = vpop.eup %1277 }
 0x27d   : > { %v1144_v5 = vmul.f32 %v1278_v3, %v1138_v49 }
 0x27f   : > { %1146 = vst [vmem:[%s170_s28 + $0x8] sm:$0xff] %v1144_v5 }
 0x280 PF: > { %s13_s12 = sadd.s32 1, %s1285_s12  }
 0x281   : > { %p10_p4 = scmp.ge.s32.totalorder %s13_s12, 4  }
 0x283   :  { %12 = sbr.rel (!%p10_p4) target bundleno = 1 (0x1), region = 97 }

</bundles_post_ra>
